<compile_context>
chip_gen: v7x
topology: tpu7x:2x2x1
jax: 0.10.0
libtpu: 0.0.40
codegen_flags: <defaults>
</compile_context>

<pallas_src>
import math

import jax
import jax.numpy as jnp
from jax.experimental import pallas as pl
from jax.experimental.pallas import tpu as pltpu

# ---- static model geometry (module spec: input=7, hidden=64, layers=2, fc: 64 -> 2) ----
INPUT = 7
HIDDEN = 64
H2 = 2 * HIDDEN            # packed state width [layer0 | layer1]          = 128 lanes
G = 8 * HIDDEN             # fused gate width: 4 gate blocks x (L0|L1)      = 512 lanes
IP = 8                     # input features padded to the f32 sublane count

# row layout of the single packed parameter operand (every block starts 8-row aligned)
R_WIH0 = 0                 # rows   0..7   : (IP, G)  layer-0 input proj (layer-1 cols zero)
R_BGATES = 8               # row    8      : (1, G)   fused gate bias [b0 | b1] per block
R_WFUSED = 16              # rows  16..143 : (2H, G)  fused recurrent weights
R_WFC = R_WFUSED + H2      # rows 144..271 : (2H,128) fc weight in cols 0:128 (rows 0:H zero)
R_BFC = R_WFC + H2         # row  272      : (1,128)  fc bias in cols 0:128
R_TOTAL = R_BFC + 8        # 280 rows total


def lstm_fused_kernel(x_ref,        # (S, BT, IP)   time-major input block
                      params_ref,   # (R_TOTAL, G)  packed weights/biases
                      out_ref,      # (BT, 128)     lane-dense fc output (cols 0:2 real)
                      xproj_ref):   # (S, BT, G)    VMEM scratch: hoisted input projection
    S, BT, _ = x_ref.shape

    # ---- hoisted layer-0 input projection (+ both gate biases folded), into VMEM scratch ----
    wih0 = params_ref[R_WIH0:R_WIH0 + IP, :]                          # (IP, G)
    b_gates = params_ref[R_BGATES:R_BGATES + 1, :]                    # (1, G)
    for t in range(S):
        xproj_ref[t] = (jnp.dot(x_ref[t], wih0,
                                preferred_element_type=jnp.float32) + b_gates)

    def packed_update(gates, c_prev):
        # gate blocks (each a full 128-lane vreg, packed [layer0 | layer1]):
        #   cols 0:3*H2 = i, f, o (sigmoid)   cols 3*H2:4*H2 = g (tanh)
        sig = 0.5 * jnp.tanh(0.5 * gates[:, :3 * H2]) + 0.5    # sigmoid via one EUP tanh
        i = sig[:, :H2]
        f = sig[:, H2:2 * H2]
        o = sig[:, 2 * H2:3 * H2]
        g = jnp.tanh(gates[:, 3 * H2:])
        c = f * c_prev + i * g
        h = o * jnp.tanh(c)
        return h, c

    # keep-layer-0-only mask, used once at t == 0 (hoisted out of the loop)
    l0_mask = (jax.lax.broadcasted_iota(jnp.int32, (1, H2), 1) < HIDDEN).astype(jnp.float32)

    h = jnp.zeros((BT, H2), jnp.float32)      # [h1 | h2]
    c = jnp.zeros((BT, H2), jnp.float32)      # [c1 | c2]

    # Skewed recurrence: iteration t computes layer-0 gates for step t AND layer-1 gates for
    # step t-1 with ONE (BT,128)x(128,512) matmul; the packed output [h1(t) | h2(t-1)] is
    # directly the next iteration's LHS (no concatenate / lane shuffles on the critical path).
    # TODO(synk): optionally keep the loop-invariant fused RHS resident in MXU weight regs via
    #             pltpu.matmul_push_rhs / matmul_acc_lhs / matmul_pop.
    for t in range(S):
        if t == 0:
            gates = xproj_ref[0]              # h1(-1) = h2(-2) = 0 -> recurrent term is zero
        else:
            gates = xproj_ref[t] + jnp.dot(
                h, params_ref[R_WFUSED:R_WFUSED + H2, :],
                preferred_element_type=jnp.float32)
        h, c = packed_update(gates, c)
        if t == 0:
            h = h * l0_mask                   # layer-1 state for "step -1" must stay zero
            c = c * l0_mask

    # Epilogue: layer-1 gates for the last step.  The layer-0 half of this update is dead:
    # the fc weight rows for the layer-0 half are zero, so it never reaches the output.
    gates = (jnp.dot(h, params_ref[R_WFUSED:R_WFUSED + H2, :],
                     preferred_element_type=jnp.float32)
             + params_ref[R_BGATES:R_BGATES + 1, :])
    h, _ = packed_update(gates, c)

    # fc(out[:, -1, :]) into a lane-dense (BT, 128) block (real outputs live in cols 0:2).
    out_ref[...] = (jnp.dot(h, params_ref[R_WFC:R_WFC + H2, 0:H2],
                            preferred_element_type=jnp.float32)
                    + params_ref[R_BFC:R_BFC + 1, 0:H2])


def lstm_price_predictor(x, kp):
    """x: (B, S, input_size) float32 -> (B, 2) float32."""
    B, S, I = x.shape
    assert I <= IP
    # Batch tile: one MXU-friendly tile per grid step; the grid axis is "parallel" so on
    # multi-TensorCore parts (v7x) batch tiles are sharded across cores.
    BT = 128 if B > 128 else max(8, ((B + 7) // 8) * 8)
    Bp = ((B + BT - 1) // BT) * BT

    # time-major, feature-padded input: the per-step slab x[t] is a clean (BT, IP) tile.
    x_tm = jnp.zeros((S, Bp, IP), jnp.float32)
    x_tm = x_tm.at[:, :B, :I].set(jnp.transpose(x.astype(jnp.float32), (1, 0, 2)))

    out = pl.pallas_call(
        lstm_fused_kernel,
        out_shape=jax.ShapeDtypeStruct((Bp, H2), jnp.float32),
        grid_spec=pltpu.PrefetchScalarGridSpec(
            num_scalar_prefetch=0,
            grid=(Bp // BT,),
            in_specs=[
                pl.BlockSpec((S, BT, IP), lambda b: (0, b, 0)),
                pl.BlockSpec((R_TOTAL, G), lambda b: (0, 0)),
            ],
            out_specs=pl.BlockSpec((BT, H2), lambda b: (b, 0)),
            scratch_shapes=[pltpu.VMEM((S, BT, G), jnp.float32)],
        ),
        compiler_params=pltpu.CompilerParams(dimension_semantics=("parallel",)),
    )(x_tm, kp["params"])
    return out[:B, :2]


def init_torch_params(key, input_size=7, hidden_size=64):
    """PyTorch-layout parameters with PyTorch's default init U(-1/sqrt(H), 1/sqrt(H))."""
    H = hidden_size
    bound = 1.0 / math.sqrt(H)
    ks = jax.random.split(key, 10)

    def u(k, shape):
        return jax.random.uniform(k, shape, jnp.float32, minval=-bound, maxval=bound)

    return dict(
        w_ih_l0=u(ks[0], (4 * H, input_size)), w_hh_l0=u(ks[1], (4 * H, H)),
        b_ih_l0=u(ks[2], (4 * H,)), b_hh_l0=u(ks[3], (4 * H,)),
        w_ih_l1=u(ks[4], (4 * H, H)), w_hh_l1=u(ks[5], (4 * H, H)),
        b_ih_l1=u(ks[6], (4 * H,)), b_hh_l1=u(ks[7], (4 * H,)),
        w_fc=u(ks[8], (2, H)), b_fc=u(ks[9], (2,)),
    )


def prepare_kernel_params(tp):
    """Pack all weights into ONE lane-dense (R_TOTAL, G) f32 operand.

    Fused gate axis (width G=8H): four 128-lane blocks in order (i, f, o, g); within each
    block, lanes 0:H belong to layer 0 and lanes H:2H to layer 1, so every gate slice the
    kernel touches is a whole vreg and lines up lane-for-lane with the packed [h1|h2]/[c1|c2]
    state.  Row blocks: layer-0 input projection, fused gate bias, fused recurrent RHS
    [[whh0, wih1], [0, whh1]], fc weight (layer-0 rows zeroed), fc bias.
    """
    H = HIDDEN
    order = (0, 1, 3, 2)      # PyTorch gate chunks are (i, f, g, o) -> reorder to (i, f, o, g)

    def chunk(a, k):          # k-th PyTorch gate chunk along the 4H axis
        return a[..., k * H:(k + 1) * H]

    wih0_t = tp["w_ih_l0"].T            # (I, 4H)
    whh0_t = tp["w_hh_l0"].T            # (H, 4H)
    wih1_t = tp["w_ih_l1"].T            # (H, 4H)
    whh1_t = tp["w_hh_l1"].T            # (H, 4H)
    b0 = tp["b_ih_l0"] + tp["b_hh_l0"]  # (4H,)
    b1 = tp["b_ih_l1"] + tp["b_hh_l1"]  # (4H,)
    I = wih0_t.shape[0]

    params = jnp.zeros((R_TOTAL, G), jnp.float32)
    for kk, pk in enumerate(order):
        c0 = kk * H2          # layer-0 lanes of this gate block
        c1 = c0 + H           # layer-1 lanes
        # layer-0 input projection (x @ wih0 + biases); layer-1 gate columns stay 0 here
        params = params.at[R_WIH0:R_WIH0 + I, c0:c0 + H].set(chunk(wih0_t, pk))
        params = params.at[R_BGATES, c0:c0 + H].set(chunk(b0, pk))
        params = params.at[R_BGATES, c1:c1 + H].set(chunk(b1, pk))
        # fused recurrent RHS (2H, G): rows 0:H multiply h1, rows H:2H multiply h2
        params = params.at[R_WFUSED:R_WFUSED + H, c0:c0 + H].set(chunk(whh0_t, pk))
        params = params.at[R_WFUSED:R_WFUSED + H, c1:c1 + H].set(chunk(wih1_t, pk))
        params = params.at[R_WFUSED + H:R_WFUSED + H2, c1:c1 + H].set(chunk(whh1_t, pk))
        # rows H:2H of the layer-0 columns stay 0: h2 never feeds layer-0 gates.

    # fc: only the layer-1 half of the packed h feeds the output; 128-lane-dense columns.
    params = params.at[R_WFC + H:R_WFC + H2, 0:2].set(tp["w_fc"].T)
    params = params.at[R_BFC, 0:2].set(tp["b_fc"])
    return dict(params=params)


def reference_forward(x, tp):
    """Pure-JAX reference implementing nn.LSTM(batch_first=True) + fc, PyTorch gate order."""
    H = tp["w_hh_l0"].shape[1]
    B, S, _ = x.shape

    def cell(x_t, h, c, w_ih, w_hh, b_ih, b_hh):
        g = x_t @ w_ih.T + h @ w_hh.T + b_ih + b_hh
        i = jax.nn.sigmoid(g[:, :H])
        f = jax.nn.sigmoid(g[:, H:2 * H])
        gg = jnp.tanh(g[:, 2 * H:3 * H])
        o = jax.nn.sigmoid(g[:, 3 * H:])
        c = f * c + i * gg
        h = o * jnp.tanh(c)
        return h, c

    h1 = c1 = h2 = c2 = jnp.zeros((B, H), jnp.float32)
    for t in range(S):
        h1, c1 = cell(x[:, t, :], h1, c1,
                      tp["w_ih_l0"], tp["w_hh_l0"], tp["b_ih_l0"], tp["b_hh_l0"])
        h2, c2 = cell(h1, h2, c2,
                      tp["w_ih_l1"], tp["w_hh_l1"], tp["b_ih_l1"], tp["b_hh_l1"])
    return h2 @ tp["w_fc"].T + tp["b_fc"]


if __name__ == "__main__":
    key = jax.random.PRNGKey(0)
    k_x, k_p = jax.random.split(key)

    B, S = 2, 8
    x = jax.random.normal(k_x, (B, S, INPUT), jnp.float32)
    torch_params = init_torch_params(k_p, input_size=INPUT, hidden_size=HIDDEN)
    kernel_params = prepare_kernel_params(torch_params)

    out = jax.block_until_ready(lstm_price_predictor(x, kernel_params))
    ref = jax.block_until_ready(reference_forward(x, torch_params))

    assert out.shape == (B, 2)
    assert jnp.allclose(out, ref, atol=1e-4, rtol=1e-4), (out, ref)
    print("KERNEL_OK")
</pallas_src>

<mosaic_0001>
module attributes {stable_mosaic.version = 11 : i64} {
  func.func @lstm_fused_kernel(%arg0: i32, %arg1: memref<8x8x8xf32, #tpu.memory_space<vmem>>, %arg2: memref<280x512xf32, #tpu.memory_space<vmem>>, %arg3: memref<8x128xf32, #tpu.memory_space<vmem>>, %arg4: memref<8x8x512xf32, #tpu.memory_space<vmem>>) attributes {dimension_semantics = [#tpu.dimension_semantics<parallel>], iteration_bounds = array<i64: 1>, scalar_prefetch = 0 : i64, scratch_operands = 1 : i64, tpu.core_type = #tpu.core_type<tc>, window_params = [{transform_indices = @transform_0, window_bounds = array<i64: 8, 8, 8>}, {pipeline_mode = #tpu.pipeline_mode<synchronous>, transform_indices = @transform_1, window_bounds = array<i64: 280, 512>}, {transform_indices = @transform_2, window_bounds = array<i64: 8, 128>}]} {
    %c0 = arith.constant 0 : index
    %c0_0 = arith.constant 0 : index
    %0 = vector.load %arg2[%c0, %c0_0] : memref<280x512xf32, #tpu.memory_space<vmem>>, vector<8x512xf32>
    %c8 = arith.constant 8 : index
    %c0_1 = arith.constant 0 : index
    %1 = vector.load %arg2[%c8, %c0_1] : memref<280x512xf32, #tpu.memory_space<vmem>>, vector<1x512xf32>
    %c0_2 = arith.constant 0 : index
    %c0_3 = arith.constant 0 : index
    %c0_4 = arith.constant 0 : index
    %2 = vector.load %arg1[%c0_2, %c0_3, %c0_4] : memref<8x8x8xf32, #tpu.memory_space<vmem>>, vector<1x8x8xf32>
    %3 = vector.shape_cast %2 : vector<1x8x8xf32> to vector<8x8xf32>
    %cst = arith.constant dense<0.000000e+00> : vector<8x512xf32>
    %4 = tpu.matmul %3, %0, %cst {dimension_numbers = #tpu.dot_dimension_numbers<[1], [0], [0], [1], [0, 0, 1, 1], [], []>} : vector<8x8xf32>, vector<8x512xf32>, vector<8x512xf32> -> vector<8x512xf32>
    %5 = vector.broadcast %1 : vector<1x512xf32> to vector<8x512xf32>
    %6 = arith.addf %4, %5 : vector<8x512xf32>
    %c0_5 = arith.constant 0 : index
    %c0_6 = arith.constant 0 : index
    %c0_7 = arith.constant 0 : index
    %7 = vector.load %arg4[%c0_5, %c0_6, %c0_7] : memref<8x8x512xf32, #tpu.memory_space<vmem>>, vector<1x8x512xf32>
    %8 = vector.shape_cast %7 : vector<1x8x512xf32> to vector<8x512xf32>
    %9 = vector.shape_cast %6 : vector<8x512xf32> to vector<1x8x512xf32>
    tpu.vector_store %arg4[%c0_5, %c0_6, %c0_7], %9 {strides = array<i32>} : memref<8x8x512xf32, #tpu.memory_space<vmem>>, vector<1x8x512xf32>,
    %c1 = arith.constant 1 : index
    %c0_8 = arith.constant 0 : index
    %c0_9 = arith.constant 0 : index
    %10 = vector.load %arg1[%c1, %c0_8, %c0_9] : memref<8x8x8xf32, #tpu.memory_space<vmem>>, vector<1x8x8xf32>
    %11 = vector.shape_cast %10 : vector<1x8x8xf32> to vector<8x8xf32>
    %cst_10 = arith.constant dense<0.000000e+00> : vector<8x512xf32>
    %12 = tpu.matmul %11, %0, %cst_10 {dimension_numbers = #tpu.dot_dimension_numbers<[1], [0], [0], [1], [0, 0, 1, 1], [], []>} : vector<8x8xf32>, vector<8x512xf32>, vector<8x512xf32> -> vector<8x512xf32>
    %13 = vector.broadcast %1 : vector<1x512xf32> to vector<8x512xf32>
    %14 = arith.addf %12, %13 : vector<8x512xf32>
    %c1_11 = arith.constant 1 : index
    %c0_12 = arith.constant 0 : index
    %c0_13 = arith.constant 0 : index
    %15 = vector.load %arg4[%c1_11, %c0_12, %c0_13] : memref<8x8x512xf32, #tpu.memory_space<vmem>>, vector<1x8x512xf32>
    %16 = vector.shape_cast %15 : vector<1x8x512xf32> to vector<8x512xf32>
    %17 = vector.shape_cast %14 : vector<8x512xf32> to vector<1x8x512xf32>
    tpu.vector_store %arg4[%c1_11, %c0_12, %c0_13], %17 {strides = array<i32>} : memref<8x8x512xf32, #tpu.memory_space<vmem>>, vector<1x8x512xf32>,
    %c2 = arith.constant 2 : index
    %c0_14 = arith.constant 0 : index
    %c0_15 = arith.constant 0 : index
    %18 = vector.load %arg1[%c2, %c0_14, %c0_15] : memref<8x8x8xf32, #tpu.memory_space<vmem>>, vector<1x8x8xf32>
    %19 = vector.shape_cast %18 : vector<1x8x8xf32> to vector<8x8xf32>
    %cst_16 = arith.constant dense<0.000000e+00> : vector<8x512xf32>
    %20 = tpu.matmul %19, %0, %cst_16 {dimension_numbers = #tpu.dot_dimension_numbers<[1], [0], [0], [1], [0, 0, 1, 1], [], []>} : vector<8x8xf32>, vector<8x512xf32>, vector<8x512xf32> -> vector<8x512xf32>
    %21 = vector.broadcast %1 : vector<1x512xf32> to vector<8x512xf32>
    %22 = arith.addf %20, %21 : vector<8x512xf32>
    %c2_17 = arith.constant 2 : index
    %c0_18 = arith.constant 0 : index
    %c0_19 = arith.constant 0 : index
    %23 = vector.load %arg4[%c2_17, %c0_18, %c0_19] : memref<8x8x512xf32, #tpu.memory_space<vmem>>, vector<1x8x512xf32>
    %24 = vector.shape_cast %23 : vector<1x8x512xf32> to vector<8x512xf32>
    %25 = vector.shape_cast %22 : vector<8x512xf32> to vector<1x8x512xf32>
    tpu.vector_store %arg4[%c2_17, %c0_18, %c0_19], %25 {strides = array<i32>} : memref<8x8x512xf32, #tpu.memory_space<vmem>>, vector<1x8x512xf32>,
    %c3 = arith.constant 3 : index
    %c0_20 = arith.constant 0 : index
    %c0_21 = arith.constant 0 : index
    %26 = vector.load %arg1[%c3, %c0_20, %c0_21] : memref<8x8x8xf32, #tpu.memory_space<vmem>>, vector<1x8x8xf32>
    %27 = vector.shape_cast %26 : vector<1x8x8xf32> to vector<8x8xf32>
    %cst_22 = arith.constant dense<0.000000e+00> : vector<8x512xf32>
    %28 = tpu.matmul %27, %0, %cst_22 {dimension_numbers = #tpu.dot_dimension_numbers<[1], [0], [0], [1], [0, 0, 1, 1], [], []>} : vector<8x8xf32>, vector<8x512xf32>, vector<8x512xf32> -> vector<8x512xf32>
    %29 = vector.broadcast %1 : vector<1x512xf32> to vector<8x512xf32>
    %30 = arith.addf %28, %29 : vector<8x512xf32>
    %c3_23 = arith.constant 3 : index
    %c0_24 = arith.constant 0 : index
    %c0_25 = arith.constant 0 : index
    %31 = vector.load %arg4[%c3_23, %c0_24, %c0_25] : memref<8x8x512xf32, #tpu.memory_space<vmem>>, vector<1x8x512xf32>
    %32 = vector.shape_cast %31 : vector<1x8x512xf32> to vector<8x512xf32>
    %33 = vector.shape_cast %30 : vector<8x512xf32> to vector<1x8x512xf32>
    tpu.vector_store %arg4[%c3_23, %c0_24, %c0_25], %33 {strides = array<i32>} : memref<8x8x512xf32, #tpu.memory_space<vmem>>, vector<1x8x512xf32>,
    %c4 = arith.constant 4 : index
    %c0_26 = arith.constant 0 : index
    %c0_27 = arith.constant 0 : index
    %34 = vector.load %arg1[%c4, %c0_26, %c0_27] : memref<8x8x8xf32, #tpu.memory_space<vmem>>, vector<1x8x8xf32>
    %35 = vector.shape_cast %34 : vector<1x8x8xf32> to vector<8x8xf32>
    %cst_28 = arith.constant dense<0.000000e+00> : vector<8x512xf32>
    %36 = tpu.matmul %35, %0, %cst_28 {dimension_numbers = #tpu.dot_dimension_numbers<[1], [0], [0], [1], [0, 0, 1, 1], [], []>} : vector<8x8xf32>, vector<8x512xf32>, vector<8x512xf32> -> vector<8x512xf32>
    %37 = vector.broadcast %1 : vector<1x512xf32> to vector<8x512xf32>
    %38 = arith.addf %36, %37 : vector<8x512xf32>
    %c4_29 = arith.constant 4 : index
    %c0_30 = arith.constant 0 : index
    %c0_31 = arith.constant 0 : index
    %39 = vector.load %arg4[%c4_29, %c0_30, %c0_31] : memref<8x8x512xf32, #tpu.memory_space<vmem>>, vector<1x8x512xf32>
    %40 = vector.shape_cast %39 : vector<1x8x512xf32> to vector<8x512xf32>
    %41 = vector.shape_cast %38 : vector<8x512xf32> to vector<1x8x512xf32>
    tpu.vector_store %arg4[%c4_29, %c0_30, %c0_31], %41 {strides = array<i32>} : memref<8x8x512xf32, #tpu.memory_space<vmem>>, vector<1x8x512xf32>,
    %c5 = arith.constant 5 : index
    %c0_32 = arith.constant 0 : index
    %c0_33 = arith.constant 0 : index
    %42 = vector.load %arg1[%c5, %c0_32, %c0_33] : memref<8x8x8xf32, #tpu.memory_space<vmem>>, vector<1x8x8xf32>
    %43 = vector.shape_cast %42 : vector<1x8x8xf32> to vector<8x8xf32>
    %cst_34 = arith.constant dense<0.000000e+00> : vector<8x512xf32>
    %44 = tpu.matmul %43, %0, %cst_34 {dimension_numbers = #tpu.dot_dimension_numbers<[1], [0], [0], [1], [0, 0, 1, 1], [], []>} : vector<8x8xf32>, vector<8x512xf32>, vector<8x512xf32> -> vector<8x512xf32>
    %45 = vector.broadcast %1 : vector<1x512xf32> to vector<8x512xf32>
    %46 = arith.addf %44, %45 : vector<8x512xf32>
    %c5_35 = arith.constant 5 : index
    %c0_36 = arith.constant 0 : index
    %c0_37 = arith.constant 0 : index
    %47 = vector.load %arg4[%c5_35, %c0_36, %c0_37] : memref<8x8x512xf32, #tpu.memory_space<vmem>>, vector<1x8x512xf32>
    %48 = vector.shape_cast %47 : vector<1x8x512xf32> to vector<8x512xf32>
    %49 = vector.shape_cast %46 : vector<8x512xf32> to vector<1x8x512xf32>
    tpu.vector_store %arg4[%c5_35, %c0_36, %c0_37], %49 {strides = array<i32>} : memref<8x8x512xf32, #tpu.memory_space<vmem>>, vector<1x8x512xf32>,
    %c6 = arith.constant 6 : index
    %c0_38 = arith.constant 0 : index
    %c0_39 = arith.constant 0 : index
    %50 = vector.load %arg1[%c6, %c0_38, %c0_39] : memref<8x8x8xf32, #tpu.memory_space<vmem>>, vector<1x8x8xf32>
    %51 = vector.shape_cast %50 : vector<1x8x8xf32> to vector<8x8xf32>
    %cst_40 = arith.constant dense<0.000000e+00> : vector<8x512xf32>
    %52 = tpu.matmul %51, %0, %cst_40 {dimension_numbers = #tpu.dot_dimension_numbers<[1], [0], [0], [1], [0, 0, 1, 1], [], []>} : vector<8x8xf32>, vector<8x512xf32>, vector<8x512xf32> -> vector<8x512xf32>
    %53 = vector.broadcast %1 : vector<1x512xf32> to vector<8x512xf32>
    %54 = arith.addf %52, %53 : vector<8x512xf32>
    %c6_41 = arith.constant 6 : index
    %c0_42 = arith.constant 0 : index
    %c0_43 = arith.constant 0 : index
    %55 = vector.load %arg4[%c6_41, %c0_42, %c0_43] : memref<8x8x512xf32, #tpu.memory_space<vmem>>, vector<1x8x512xf32>
    %56 = vector.shape_cast %55 : vector<1x8x512xf32> to vector<8x512xf32>
    %57 = vector.shape_cast %54 : vector<8x512xf32> to vector<1x8x512xf32>
    tpu.vector_store %arg4[%c6_41, %c0_42, %c0_43], %57 {strides = array<i32>} : memref<8x8x512xf32, #tpu.memory_space<vmem>>, vector<1x8x512xf32>,
    %c7 = arith.constant 7 : index
    %c0_44 = arith.constant 0 : index
    %c0_45 = arith.constant 0 : index
    %58 = vector.load %arg1[%c7, %c0_44, %c0_45] : memref<8x8x8xf32, #tpu.memory_space<vmem>>, vector<1x8x8xf32>
    %59 = vector.shape_cast %58 : vector<1x8x8xf32> to vector<8x8xf32>
    %cst_46 = arith.constant dense<0.000000e+00> : vector<8x512xf32>
    %60 = tpu.matmul %59, %0, %cst_46 {dimension_numbers = #tpu.dot_dimension_numbers<[1], [0], [0], [1], [0, 0, 1, 1], [], []>} : vector<8x8xf32>, vector<8x512xf32>, vector<8x512xf32> -> vector<8x512xf32>
    %61 = vector.broadcast %1 : vector<1x512xf32> to vector<8x512xf32>
    %62 = arith.addf %60, %61 : vector<8x512xf32>
    %c7_47 = arith.constant 7 : index
    %c0_48 = arith.constant 0 : index
    %c0_49 = arith.constant 0 : index
    %63 = vector.load %arg4[%c7_47, %c0_48, %c0_49] : memref<8x8x512xf32, #tpu.memory_space<vmem>>, vector<1x8x512xf32>
    %64 = vector.shape_cast %63 : vector<1x8x512xf32> to vector<8x512xf32>
    %65 = vector.shape_cast %62 : vector<8x512xf32> to vector<1x8x512xf32>
    tpu.vector_store %arg4[%c7_47, %c0_48, %c0_49], %65 {strides = array<i32>} : memref<8x8x512xf32, #tpu.memory_space<vmem>>, vector<1x8x512xf32>,
    %66 = tpu.iota {dimensions = array<i32: 1>} : vector<1x128xi32>
    %c64_i32 = arith.constant 64 : i32
    %67 = vector.broadcast %c64_i32 : i32 to vector<1x128xi32>
    %68 = arith.cmpi slt, %66, %67 : vector<1x128xi32>
    %69 = arith.extui %68 : vector<1x128xi1> to vector<1x128xi32>
    %70 = arith.sitofp %69 : vector<1x128xi32> to vector<1x128xf32>
    %cst_50 = arith.constant 0.000000e+00 : f32
    %71 = vector.broadcast %cst_50 : f32 to vector<8x128xf32>
    %c0_51 = arith.constant 0 : index
    %c0_52 = arith.constant 0 : index
    %c0_53 = arith.constant 0 : index
    %72 = vector.load %arg4[%c0_51, %c0_52, %c0_53] : memref<8x8x512xf32, #tpu.memory_space<vmem>>, vector<1x8x512xf32>
    %73 = vector.shape_cast %72 : vector<1x8x512xf32> to vector<8x512xf32>
    %74 = vector.extract_strided_slice %73 {offsets = [0, 0], sizes = [8, 384], strides = [1, 1]} : vector<8x512xf32> to vector<8x384xf32>
    %cst_54 = arith.constant 5.000000e-01 : f32
    %75 = vector.broadcast %cst_54 : f32 to vector<8x384xf32>
    %76 = arith.mulf %75, %74 : vector<8x384xf32>
    %77 = math.tanh %76 : vector<8x384xf32>
    %cst_55 = arith.constant 5.000000e-01 : f32
    %78 = vector.broadcast %cst_55 : f32 to vector<8x384xf32>
    %79 = arith.mulf %78, %77 : vector<8x384xf32>
    %cst_56 = arith.constant 5.000000e-01 : f32
    %80 = vector.broadcast %cst_56 : f32 to vector<8x384xf32>
    %81 = arith.addf %79, %80 : vector<8x384xf32>
    %82 = vector.extract_strided_slice %81 {offsets = [0, 0], sizes = [8, 128], strides = [1, 1]} : vector<8x384xf32> to vector<8x128xf32>
    %83 = vector.extract_strided_slice %81 {offsets = [0, 128], sizes = [8, 128], strides = [1, 1]} : vector<8x384xf32> to vector<8x128xf32>
    %84 = vector.extract_strided_slice %81 {offsets = [0, 256], sizes = [8, 128], strides = [1, 1]} : vector<8x384xf32> to vector<8x128xf32>
    %85 = vector.extract_strided_slice %73 {offsets = [0, 384], sizes = [8, 128], strides = [1, 1]} : vector<8x512xf32> to vector<8x128xf32>
    %86 = math.tanh %85 : vector<8x128xf32>
    %87 = arith.mulf %83, %71 : vector<8x128xf32>
    %88 = arith.mulf %82, %86 : vector<8x128xf32>
    %89 = arith.addf %87, %88 : vector<8x128xf32>
    %90 = math.tanh %89 : vector<8x128xf32>
    %91 = arith.mulf %84, %90 : vector<8x128xf32>
    %92 = vector.broadcast %70 : vector<1x128xf32> to vector<8x128xf32>
    %93 = arith.mulf %91, %92 : vector<8x128xf32>
    %94 = vector.broadcast %70 : vector<1x128xf32> to vector<8x128xf32>
    %95 = arith.mulf %89, %94 : vector<8x128xf32>
    %c1_57 = arith.constant 1 : index
    %c0_58 = arith.constant 0 : index
    %c0_59 = arith.constant 0 : index
    %96 = vector.load %arg4[%c1_57, %c0_58, %c0_59] : memref<8x8x512xf32, #tpu.memory_space<vmem>>, vector<1x8x512xf32>
    %97 = vector.shape_cast %96 : vector<1x8x512xf32> to vector<8x512xf32>
    %c16 = arith.constant 16 : index
    %c0_60 = arith.constant 0 : index
    %98 = vector.load %arg2[%c16, %c0_60] : memref<280x512xf32, #tpu.memory_space<vmem>>, vector<128x512xf32>
    %cst_61 = arith.constant dense<0.000000e+00> : vector<8x512xf32>
    %99 = tpu.matmul %93, %98, %cst_61 {dimension_numbers = #tpu.dot_dimension_numbers<[1], [0], [0], [1], [0, 0, 1, 1], [], []>} : vector<8x128xf32>, vector<128x512xf32>, vector<8x512xf32> -> vector<8x512xf32>
    %100 = arith.addf %97, %99 : vector<8x512xf32>
    %101 = vector.extract_strided_slice %100 {offsets = [0, 0], sizes = [8, 384], strides = [1, 1]} : vector<8x512xf32> to vector<8x384xf32>
    %cst_62 = arith.constant 5.000000e-01 : f32
    %102 = vector.broadcast %cst_62 : f32 to vector<8x384xf32>
    %103 = arith.mulf %102, %101 : vector<8x384xf32>
    %104 = math.tanh %103 : vector<8x384xf32>
    %cst_63 = arith.constant 5.000000e-01 : f32
    %105 = vector.broadcast %cst_63 : f32 to vector<8x384xf32>
    %106 = arith.mulf %105, %104 : vector<8x384xf32>
    %cst_64 = arith.constant 5.000000e-01 : f32
    %107 = vector.broadcast %cst_64 : f32 to vector<8x384xf32>
    %108 = arith.addf %106, %107 : vector<8x384xf32>
    %109 = vector.extract_strided_slice %108 {offsets = [0, 0], sizes = [8, 128], strides = [1, 1]} : vector<8x384xf32> to vector<8x128xf32>
    %110 = vector.extract_strided_slice %108 {offsets = [0, 128], sizes = [8, 128], strides = [1, 1]} : vector<8x384xf32> to vector<8x128xf32>
    %111 = vector.extract_strided_slice %108 {offsets = [0, 256], sizes = [8, 128], strides = [1, 1]} : vector<8x384xf32> to vector<8x128xf32>
    %112 = vector.extract_strided_slice %100 {offsets = [0, 384], sizes = [8, 128], strides = [1, 1]} : vector<8x512xf32> to vector<8x128xf32>
    %113 = math.tanh %112 : vector<8x128xf32>
    %114 = arith.mulf %110, %95 : vector<8x128xf32>
    %115 = arith.mulf %109, %113 : vector<8x128xf32>
    %116 = arith.addf %114, %115 : vector<8x128xf32>
    %117 = math.tanh %116 : vector<8x128xf32>
    %118 = arith.mulf %111, %117 : vector<8x128xf32>
    %c2_65 = arith.constant 2 : index
    %c0_66 = arith.constant 0 : index
    %c0_67 = arith.constant 0 : index
    %119 = vector.load %arg4[%c2_65, %c0_66, %c0_67] : memref<8x8x512xf32, #tpu.memory_space<vmem>>, vector<1x8x512xf32>
    %120 = vector.shape_cast %119 : vector<1x8x512xf32> to vector<8x512xf32>
    %c16_68 = arith.constant 16 : index
    %c0_69 = arith.constant 0 : index
    %121 = vector.load %arg2[%c16_68, %c0_69] : memref<280x512xf32, #tpu.memory_space<vmem>>, vector<128x512xf32>
    %cst_70 = arith.constant dense<0.000000e+00> : vector<8x512xf32>
    %122 = tpu.matmul %118, %121, %cst_70 {dimension_numbers = #tpu.dot_dimension_numbers<[1], [0], [0], [1], [0, 0, 1, 1], [], []>} : vector<8x128xf32>, vector<128x512xf32>, vector<8x512xf32> -> vector<8x512xf32>
    %123 = arith.addf %120, %122 : vector<8x512xf32>
    %124 = vector.extract_strided_slice %123 {offsets = [0, 0], sizes = [8, 384], strides = [1, 1]} : vector<8x512xf32> to vector<8x384xf32>
    %cst_71 = arith.constant 5.000000e-01 : f32
    %125 = vector.broadcast %cst_71 : f32 to vector<8x384xf32>
    %126 = arith.mulf %125, %124 : vector<8x384xf32>
    %127 = math.tanh %126 : vector<8x384xf32>
    %cst_72 = arith.constant 5.000000e-01 : f32
    %128 = vector.broadcast %cst_72 : f32 to vector<8x384xf32>
    %129 = arith.mulf %128, %127 : vector<8x384xf32>
    %cst_73 = arith.constant 5.000000e-01 : f32
    %130 = vector.broadcast %cst_73 : f32 to vector<8x384xf32>
    %131 = arith.addf %129, %130 : vector<8x384xf32>
    %132 = vector.extract_strided_slice %131 {offsets = [0, 0], sizes = [8, 128], strides = [1, 1]} : vector<8x384xf32> to vector<8x128xf32>
    %133 = vector.extract_strided_slice %131 {offsets = [0, 128], sizes = [8, 128], strides = [1, 1]} : vector<8x384xf32> to vector<8x128xf32>
    %134 = vector.extract_strided_slice %131 {offsets = [0, 256], sizes = [8, 128], strides = [1, 1]} : vector<8x384xf32> to vector<8x128xf32>
    %135 = vector.extract_strided_slice %123 {offsets = [0, 384], sizes = [8, 128], strides = [1, 1]} : vector<8x512xf32> to vector<8x128xf32>
    %136 = math.tanh %135 : vector<8x128xf32>
    %137 = arith.mulf %133, %116 : vector<8x128xf32>
    %138 = arith.mulf %132, %136 : vector<8x128xf32>
    %139 = arith.addf %137, %138 : vector<8x128xf32>
    %140 = math.tanh %139 : vector<8x128xf32>
    %141 = arith.mulf %134, %140 : vector<8x128xf32>
    %c3_74 = arith.constant 3 : index
    %c0_75 = arith.constant 0 : index
    %c0_76 = arith.constant 0 : index
    %142 = vector.load %arg4[%c3_74, %c0_75, %c0_76] : memref<8x8x512xf32, #tpu.memory_space<vmem>>, vector<1x8x512xf32>
    %143 = vector.shape_cast %142 : vector<1x8x512xf32> to vector<8x512xf32>
    %c16_77 = arith.constant 16 : index
    %c0_78 = arith.constant 0 : index
    %144 = vector.load %arg2[%c16_77, %c0_78] : memref<280x512xf32, #tpu.memory_space<vmem>>, vector<128x512xf32>
    %cst_79 = arith.constant dense<0.000000e+00> : vector<8x512xf32>
    %145 = tpu.matmul %141, %144, %cst_79 {dimension_numbers = #tpu.dot_dimension_numbers<[1], [0], [0], [1], [0, 0, 1, 1], [], []>} : vector<8x128xf32>, vector<128x512xf32>, vector<8x512xf32> -> vector<8x512xf32>
    %146 = arith.addf %143, %145 : vector<8x512xf32>
    %147 = vector.extract_strided_slice %146 {offsets = [0, 0], sizes = [8, 384], strides = [1, 1]} : vector<8x512xf32> to vector<8x384xf32>
    %cst_80 = arith.constant 5.000000e-01 : f32
    %148 = vector.broadcast %cst_80 : f32 to vector<8x384xf32>
    %149 = arith.mulf %148, %147 : vector<8x384xf32>
    %150 = math.tanh %149 : vector<8x384xf32>
    %cst_81 = arith.constant 5.000000e-01 : f32
    %151 = vector.broadcast %cst_81 : f32 to vector<8x384xf32>
    %152 = arith.mulf %151, %150 : vector<8x384xf32>
    %cst_82 = arith.constant 5.000000e-01 : f32
    %153 = vector.broadcast %cst_82 : f32 to vector<8x384xf32>
    %154 = arith.addf %152, %153 : vector<8x384xf32>
    %155 = vector.extract_strided_slice %154 {offsets = [0, 0], sizes = [8, 128], strides = [1, 1]} : vector<8x384xf32> to vector<8x128xf32>
    %156 = vector.extract_strided_slice %154 {offsets = [0, 128], sizes = [8, 128], strides = [1, 1]} : vector<8x384xf32> to vector<8x128xf32>
    %157 = vector.extract_strided_slice %154 {offsets = [0, 256], sizes = [8, 128], strides = [1, 1]} : vector<8x384xf32> to vector<8x128xf32>
    %158 = vector.extract_strided_slice %146 {offsets = [0, 384], sizes = [8, 128], strides = [1, 1]} : vector<8x512xf32> to vector<8x128xf32>
    %159 = math.tanh %158 : vector<8x128xf32>
    %160 = arith.mulf %156, %139 : vector<8x128xf32>
    %161 = arith.mulf %155, %159 : vector<8x128xf32>
    %162 = arith.addf %160, %161 : vector<8x128xf32>
    %163 = math.tanh %162 : vector<8x128xf32>
    %164 = arith.mulf %157, %163 : vector<8x128xf32>
    %c4_83 = arith.constant 4 : index
    %c0_84 = arith.constant 0 : index
    %c0_85 = arith.constant 0 : index
    %165 = vector.load %arg4[%c4_83, %c0_84, %c0_85] : memref<8x8x512xf32, #tpu.memory_space<vmem>>, vector<1x8x512xf32>
    %166 = vector.shape_cast %165 : vector<1x8x512xf32> to vector<8x512xf32>
    %c16_86 = arith.constant 16 : index
    %c0_87 = arith.constant 0 : index
    %167 = vector.load %arg2[%c16_86, %c0_87] : memref<280x512xf32, #tpu.memory_space<vmem>>, vector<128x512xf32>
    %cst_88 = arith.constant dense<0.000000e+00> : vector<8x512xf32>
    %168 = tpu.matmul %164, %167, %cst_88 {dimension_numbers = #tpu.dot_dimension_numbers<[1], [0], [0], [1], [0, 0, 1, 1], [], []>} : vector<8x128xf32>, vector<128x512xf32>, vector<8x512xf32> -> vector<8x512xf32>
    %169 = arith.addf %166, %168 : vector<8x512xf32>
    %170 = vector.extract_strided_slice %169 {offsets = [0, 0], sizes = [8, 384], strides = [1, 1]} : vector<8x512xf32> to vector<8x384xf32>
    %cst_89 = arith.constant 5.000000e-01 : f32
    %171 = vector.broadcast %cst_89 : f32 to vector<8x384xf32>
    %172 = arith.mulf %171, %170 : vector<8x384xf32>
    %173 = math.tanh %172 : vector<8x384xf32>
    %cst_90 = arith.constant 5.000000e-01 : f32
    %174 = vector.broadcast %cst_90 : f32 to vector<8x384xf32>
    %175 = arith.mulf %174, %173 : vector<8x384xf32>
    %cst_91 = arith.constant 5.000000e-01 : f32
    %176 = vector.broadcast %cst_91 : f32 to vector<8x384xf32>
    %177 = arith.addf %175, %176 : vector<8x384xf32>
    %178 = vector.extract_strided_slice %177 {offsets = [0, 0], sizes = [8, 128], strides = [1, 1]} : vector<8x384xf32> to vector<8x128xf32>
    %179 = vector.extract_strided_slice %177 {offsets = [0, 128], sizes = [8, 128], strides = [1, 1]} : vector<8x384xf32> to vector<8x128xf32>
    %180 = vector.extract_strided_slice %177 {offsets = [0, 256], sizes = [8, 128], strides = [1, 1]} : vector<8x384xf32> to vector<8x128xf32>
    %181 = vector.extract_strided_slice %169 {offsets = [0, 384], sizes = [8, 128], strides = [1, 1]} : vector<8x512xf32> to vector<8x128xf32>
    %182 = math.tanh %181 : vector<8x128xf32>
    %183 = arith.mulf %179, %162 : vector<8x128xf32>
    %184 = arith.mulf %178, %182 : vector<8x128xf32>
    %185 = arith.addf %183, %184 : vector<8x128xf32>
    %186 = math.tanh %185 : vector<8x128xf32>
    %187 = arith.mulf %180, %186 : vector<8x128xf32>
    %c5_92 = arith.constant 5 : index
    %c0_93 = arith.constant 0 : index
    %c0_94 = arith.constant 0 : index
    %188 = vector.load %arg4[%c5_92, %c0_93, %c0_94] : memref<8x8x512xf32, #tpu.memory_space<vmem>>, vector<1x8x512xf32>
    %189 = vector.shape_cast %188 : vector<1x8x512xf32> to vector<8x512xf32>
    %c16_95 = arith.constant 16 : index
    %c0_96 = arith.constant 0 : index
    %190 = vector.load %arg2[%c16_95, %c0_96] : memref<280x512xf32, #tpu.memory_space<vmem>>, vector<128x512xf32>
    %cst_97 = arith.constant dense<0.000000e+00> : vector<8x512xf32>
    %191 = tpu.matmul %187, %190, %cst_97 {dimension_numbers = #tpu.dot_dimension_numbers<[1], [0], [0], [1], [0, 0, 1, 1], [], []>} : vector<8x128xf32>, vector<128x512xf32>, vector<8x512xf32> -> vector<8x512xf32>
    %192 = arith.addf %189, %191 : vector<8x512xf32>
    %193 = vector.extract_strided_slice %192 {offsets = [0, 0], sizes = [8, 384], strides = [1, 1]} : vector<8x512xf32> to vector<8x384xf32>
    %cst_98 = arith.constant 5.000000e-01 : f32
    %194 = vector.broadcast %cst_98 : f32 to vector<8x384xf32>
    %195 = arith.mulf %194, %193 : vector<8x384xf32>
    %196 = math.tanh %195 : vector<8x384xf32>
    %cst_99 = arith.constant 5.000000e-01 : f32
    %197 = vector.broadcast %cst_99 : f32 to vector<8x384xf32>
    %198 = arith.mulf %197, %196 : vector<8x384xf32>
    %cst_100 = arith.constant 5.000000e-01 : f32
    %199 = vector.broadcast %cst_100 : f32 to vector<8x384xf32>
    %200 = arith.addf %198, %199 : vector<8x384xf32>
    %201 = vector.extract_strided_slice %200 {offsets = [0, 0], sizes = [8, 128], strides = [1, 1]} : vector<8x384xf32> to vector<8x128xf32>
    %202 = vector.extract_strided_slice %200 {offsets = [0, 128], sizes = [8, 128], strides = [1, 1]} : vector<8x384xf32> to vector<8x128xf32>
    %203 = vector.extract_strided_slice %200 {offsets = [0, 256], sizes = [8, 128], strides = [1, 1]} : vector<8x384xf32> to vector<8x128xf32>
    %204 = vector.extract_strided_slice %192 {offsets = [0, 384], sizes = [8, 128], strides = [1, 1]} : vector<8x512xf32> to vector<8x128xf32>
    %205 = math.tanh %204 : vector<8x128xf32>
    %206 = arith.mulf %202, %185 : vector<8x128xf32>
    %207 = arith.mulf %201, %205 : vector<8x128xf32>
    %208 = arith.addf %206, %207 : vector<8x128xf32>
    %209 = math.tanh %208 : vector<8x128xf32>
    %210 = arith.mulf %203, %209 : vector<8x128xf32>
    %c6_101 = arith.constant 6 : index
    %c0_102 = arith.constant 0 : index
    %c0_103 = arith.constant 0 : index
    %211 = vector.load %arg4[%c6_101, %c0_102, %c0_103] : memref<8x8x512xf32, #tpu.memory_space<vmem>>, vector<1x8x512xf32>
    %212 = vector.shape_cast %211 : vector<1x8x512xf32> to vector<8x512xf32>
    %c16_104 = arith.constant 16 : index
    %c0_105 = arith.constant 0 : index
    %213 = vector.load %arg2[%c16_104, %c0_105] : memref<280x512xf32, #tpu.memory_space<vmem>>, vector<128x512xf32>
    %cst_106 = arith.constant dense<0.000000e+00> : vector<8x512xf32>
    %214 = tpu.matmul %210, %213, %cst_106 {dimension_numbers = #tpu.dot_dimension_numbers<[1], [0], [0], [1], [0, 0, 1, 1], [], []>} : vector<8x128xf32>, vector<128x512xf32>, vector<8x512xf32> -> vector<8x512xf32>
    %215 = arith.addf %212, %214 : vector<8x512xf32>
    %216 = vector.extract_strided_slice %215 {offsets = [0, 0], sizes = [8, 384], strides = [1, 1]} : vector<8x512xf32> to vector<8x384xf32>
    %cst_107 = arith.constant 5.000000e-01 : f32
    %217 = vector.broadcast %cst_107 : f32 to vector<8x384xf32>
    %218 = arith.mulf %217, %216 : vector<8x384xf32>
    %219 = math.tanh %218 : vector<8x384xf32>
    %cst_108 = arith.constant 5.000000e-01 : f32
    %220 = vector.broadcast %cst_108 : f32 to vector<8x384xf32>
    %221 = arith.mulf %220, %219 : vector<8x384xf32>
    %cst_109 = arith.constant 5.000000e-01 : f32
    %222 = vector.broadcast %cst_109 : f32 to vector<8x384xf32>
    %223 = arith.addf %221, %222 : vector<8x384xf32>
    %224 = vector.extract_strided_slice %223 {offsets = [0, 0], sizes = [8, 128], strides = [1, 1]} : vector<8x384xf32> to vector<8x128xf32>
    %225 = vector.extract_strided_slice %223 {offsets = [0, 128], sizes = [8, 128], strides = [1, 1]} : vector<8x384xf32> to vector<8x128xf32>
    %226 = vector.extract_strided_slice %223 {offsets = [0, 256], sizes = [8, 128], strides = [1, 1]} : vector<8x384xf32> to vector<8x128xf32>
    %227 = vector.extract_strided_slice %215 {offsets = [0, 384], sizes = [8, 128], strides = [1, 1]} : vector<8x512xf32> to vector<8x128xf32>
    %228 = math.tanh %227 : vector<8x128xf32>
    %229 = arith.mulf %225, %208 : vector<8x128xf32>
    %230 = arith.mulf %224, %228 : vector<8x128xf32>
    %231 = arith.addf %229, %230 : vector<8x128xf32>
    %232 = math.tanh %231 : vector<8x128xf32>
    %233 = arith.mulf %226, %232 : vector<8x128xf32>
    %c7_110 = arith.constant 7 : index
    %c0_111 = arith.constant 0 : index
    %c0_112 = arith.constant 0 : index
    %234 = vector.load %arg4[%c7_110, %c0_111, %c0_112] : memref<8x8x512xf32, #tpu.memory_space<vmem>>, vector<1x8x512xf32>
    %235 = vector.shape_cast %234 : vector<1x8x512xf32> to vector<8x512xf32>
    %c16_113 = arith.constant 16 : index
    %c0_114 = arith.constant 0 : index
    %236 = vector.load %arg2[%c16_113, %c0_114] : memref<280x512xf32, #tpu.memory_space<vmem>>, vector<128x512xf32>
    %cst_115 = arith.constant dense<0.000000e+00> : vector<8x512xf32>
    %237 = tpu.matmul %233, %236, %cst_115 {dimension_numbers = #tpu.dot_dimension_numbers<[1], [0], [0], [1], [0, 0, 1, 1], [], []>} : vector<8x128xf32>, vector<128x512xf32>, vector<8x512xf32> -> vector<8x512xf32>
    %238 = arith.addf %235, %237 : vector<8x512xf32>
    %239 = vector.extract_strided_slice %238 {offsets = [0, 0], sizes = [8, 384], strides = [1, 1]} : vector<8x512xf32> to vector<8x384xf32>
    %cst_116 = arith.constant 5.000000e-01 : f32
    %240 = vector.broadcast %cst_116 : f32 to vector<8x384xf32>
    %241 = arith.mulf %240, %239 : vector<8x384xf32>
    %242 = math.tanh %241 : vector<8x384xf32>
    %cst_117 = arith.constant 5.000000e-01 : f32
    %243 = vector.broadcast %cst_117 : f32 to vector<8x384xf32>
    %244 = arith.mulf %243, %242 : vector<8x384xf32>
    %cst_118 = arith.constant 5.000000e-01 : f32
    %245 = vector.broadcast %cst_118 : f32 to vector<8x384xf32>
    %246 = arith.addf %244, %245 : vector<8x384xf32>
    %247 = vector.extract_strided_slice %246 {offsets = [0, 0], sizes = [8, 128], strides = [1, 1]} : vector<8x384xf32> to vector<8x128xf32>
    %248 = vector.extract_strided_slice %246 {offsets = [0, 128], sizes = [8, 128], strides = [1, 1]} : vector<8x384xf32> to vector<8x128xf32>
    %249 = vector.extract_strided_slice %246 {offsets = [0, 256], sizes = [8, 128], strides = [1, 1]} : vector<8x384xf32> to vector<8x128xf32>
    %250 = vector.extract_strided_slice %238 {offsets = [0, 384], sizes = [8, 128], strides = [1, 1]} : vector<8x512xf32> to vector<8x128xf32>
    %251 = math.tanh %250 : vector<8x128xf32>
    %252 = arith.mulf %248, %231 : vector<8x128xf32>
    %253 = arith.mulf %247, %251 : vector<8x128xf32>
    %254 = arith.addf %252, %253 : vector<8x128xf32>
    %255 = math.tanh %254 : vector<8x128xf32>
    %256 = arith.mulf %249, %255 : vector<8x128xf32>
    %c16_119 = arith.constant 16 : index
    %c0_120 = arith.constant 0 : index
    %257 = vector.load %arg2[%c16_119, %c0_120] : memref<280x512xf32, #tpu.memory_space<vmem>>, vector<128x512xf32>
    %cst_121 = arith.constant dense<0.000000e+00> : vector<8x512xf32>
    %258 = tpu.matmul %256, %257, %cst_121 {dimension_numbers = #tpu.dot_dimension_numbers<[1], [0], [0], [1], [0, 0, 1, 1], [], []>} : vector<8x128xf32>, vector<128x512xf32>, vector<8x512xf32> -> vector<8x512xf32>
    %c8_122 = arith.constant 8 : index
    %c0_123 = arith.constant 0 : index
    %259 = vector.load %arg2[%c8_122, %c0_123] : memref<280x512xf32, #tpu.memory_space<vmem>>, vector<1x512xf32>
    %260 = vector.broadcast %259 : vector<1x512xf32> to vector<8x512xf32>
    %261 = arith.addf %258, %260 : vector<8x512xf32>
    %262 = vector.extract_strided_slice %261 {offsets = [0, 0], sizes = [8, 384], strides = [1, 1]} : vector<8x512xf32> to vector<8x384xf32>
    %cst_124 = arith.constant 5.000000e-01 : f32
    %263 = vector.broadcast %cst_124 : f32 to vector<8x384xf32>
    %264 = arith.mulf %263, %262 : vector<8x384xf32>
    %265 = math.tanh %264 : vector<8x384xf32>
    %cst_125 = arith.constant 5.000000e-01 : f32
    %266 = vector.broadcast %cst_125 : f32 to vector<8x384xf32>
    %267 = arith.mulf %266, %265 : vector<8x384xf32>
    %cst_126 = arith.constant 5.000000e-01 : f32
    %268 = vector.broadcast %cst_126 : f32 to vector<8x384xf32>
    %269 = arith.addf %267, %268 : vector<8x384xf32>
    %270 = vector.extract_strided_slice %269 {offsets = [0, 0], sizes = [8, 128], strides = [1, 1]} : vector<8x384xf32> to vector<8x128xf32>
    %271 = vector.extract_strided_slice %269 {offsets = [0, 128], sizes = [8, 128], strides = [1, 1]} : vector<8x384xf32> to vector<8x128xf32>
    %272 = vector.extract_strided_slice %269 {offsets = [0, 256], sizes = [8, 128], strides = [1, 1]} : vector<8x384xf32> to vector<8x128xf32>
    %273 = vector.extract_strided_slice %261 {offsets = [0, 384], sizes = [8, 128], strides = [1, 1]} : vector<8x512xf32> to vector<8x128xf32>
    %274 = math.tanh %273 : vector<8x128xf32>
    %275 = arith.mulf %271, %254 : vector<8x128xf32>
    %276 = arith.mulf %270, %274 : vector<8x128xf32>
    %277 = arith.addf %275, %276 : vector<8x128xf32>
    %278 = math.tanh %277 : vector<8x128xf32>
    %279 = arith.mulf %272, %278 : vector<8x128xf32>
    %c144 = arith.constant 144 : index
    %c0_127 = arith.constant 0 : index
    %280 = vector.load %arg2[%c144, %c0_127] : memref<280x512xf32, #tpu.memory_space<vmem>>, vector<128x128xf32>
    %cst_128 = arith.constant dense<0.000000e+00> : vector<8x128xf32>
    %281 = tpu.matmul %279, %280, %cst_128 {dimension_numbers = #tpu.dot_dimension_numbers<[1], [0], [0], [1], [0, 0, 1, 1], [], []>} : vector<8x128xf32>, vector<128x128xf32>, vector<8x128xf32> -> vector<8x128xf32>
    %c272 = arith.constant 272 : index
    %c0_129 = arith.constant 0 : index
    %282 = vector.load %arg2[%c272, %c0_129] : memref<280x512xf32, #tpu.memory_space<vmem>>, vector<1x128xf32>
    %283 = vector.broadcast %282 : vector<1x128xf32> to vector<8x128xf32>
    %284 = arith.addf %281, %283 : vector<8x128xf32>
    %c0_130 = arith.constant 0 : index
    %c0_131 = arith.constant 0 : index
    %285 = vector.load %arg3[%c0_130, %c0_131] : memref<8x128xf32, #tpu.memory_space<vmem>>, vector<8x128xf32>
    tpu.vector_store %arg3[%c0_130, %c0_131], %284 {strides = array<i32>} : memref<8x128xf32, #tpu.memory_space<vmem>>, vector<8x128xf32>,
    return
  }
  func.func @transform_0(%arg0: i32) -> (i32, i32, i32) {
    %c0_i32 = arith.constant 0 : i32
    %c0_i32_0 = arith.constant 0 : i32
    %c0_i32_1 = arith.constant 0 : i32
    return %c0_i32, %arg0, %c0_i32_0 : i32, i32, i32
  }
  func.func @transform_1(%arg0: i32) -> (i32, i32) {
    %c0_i32 = arith.constant 0 : i32
    %c0_i32_0 = arith.constant 0 : i32
    %c0_i32_1 = arith.constant 0 : i32
    return %c0_i32, %c0_i32_0 : i32, i32
  }
  func.func @transform_2(%arg0: i32) -> (i32, i32) {
    %c0_i32 = arith.constant 0 : i32
    %c0_i32_0 = arith.constant 0 : i32
    return %arg0, %c0_i32 : i32, i32
  }
}

</mosaic_0001>

<bundles_post_ra>
// kernel: tpu_custom_call.1
= control target key start
LH: loop header
LB: loop body
LE: loop exit
PB: predicated region body
PF: predicated region fallthrough
CT: control target
= control target key end

     0   :  { %7 = vsyncpa [#allocation4], 0  ;;  %s4232_s0 = inlined_call_operand.hbm [shape: f32[8,8,8], index: 0, kind: input, shape index: {}]   ;;  %s4233_s1 = inlined_call_operand.hbm [shape: f32[280,512], index: 1, kind: input, shape index: {}]   ;;  %s4234_s2 = inlined_call_operand.hbm [shape: f32[8,128], index: 2, kind: output, shape index: {}]  }
   0x1   :  { %8 = vsyncpa [#allocation7], 0 }
   0x2   :  { %9 = vsyncpa [#allocation5], 0  ;;  %s3670_s9 = smov [#allocation3]   ;;  %s3598_s13 = scalar_lea.hbm %s4232_s0, 1024 }
   0x3   :  { %s15_s10 = sshll.u32 %s3670_s9, 4  ;;  %p3599_p0 = scmp.ne.s32.totalorder %s4232_s0, %s3598_s13  ;;  %s16_s10 = int_to_ptr.vmem [resolvable:$true] %s15_s10 }
   0x4   :  { %p3602_p1 = scmp.lt.u32.totalorder %s3598_s13, %s4232_s0 }
   0x6   :  { %p3604_p2 = pnand %p3602_p1, %p3599_p0 }
   0x8   :  { %3607 = shalt.err (!%p3604_p2)
}
   0x9   :  { %s3608_s18 = scalar_lea.vmem %s16_s10, 1024  ;;  %p3613_p4 = scmp.lt.s32.totalorder %s16_s10, %s16_s10 }
   0xa   :  { %p3609_p3 = scmp.ne.s32.totalorder %s16_s10, %s3608_s18  ;;  %p3614_p5 = scmp.lt.s32.totalorder %s3608_s18, %s3608_s18 }
   0xc   :  { %p3615_p6 = por %p3614_p5, %p3613_p4 }
   0xe   :  { %p3616_p7 = pnand %p3615_p6, %p3609_p3 }
  0x10   :  { %3619 = shalt.err (!%p3616_p7)
}
  0x11   :  { %s3671_s19 = smov 128   ;;  %s3672_s20 = smov 8  }
  0x12   :  { %21 = dma.hbm_to_vmem [thread:$0]  %s4232_s0, 1024, %s16_s10, [#allocation4], %s3671_s19, %s3671_s19, %s3672_s20  }
  0x13   :  { %s3673_s23 = smov [#allocation6]   ;;  %s3620_s27 = scalar_lea.hbm %s4233_s1, 17920 }
  0x14   :  { %s27_s24 = sshll.u32 %s3673_s23, 4  ;;  %p3621_p8 = scmp.ne.s32.totalorder %s4233_s1, %s3620_s27  ;;  %s28_s24 = int_to_ptr.vmem [resolvable:$true] %s27_s24 }
  0x15   :  { %p3624_p9 = scmp.lt.u32.totalorder %s3620_s27, %s4233_s1 }
  0x17   :  { %p3626_p10 = pnand %p3624_p9, %p3621_p8 }
  0x19   :  { %3629 = shalt.err (!%p3626_p10)
}
  0x1a   :  { %s3630_s4 = scalar_lea.vmem %s28_s24, 17920  ;;  %p3635_p12 = scmp.lt.s32.totalorder %s28_s24, %s28_s24 }
  0x1b   :  { %p3631_p11 = scmp.ne.s32.totalorder %s28_s24, %s3630_s4  ;;  %p3636_p13 = scmp.lt.s32.totalorder %s3630_s4, %s3630_s4 }
  0x1d   :  { %p3637_p0 = por %p3636_p13, %p3635_p12 }
  0x1f   :  { %p3638_p1 = pnand %p3637_p0, %p3631_p11 }
  0x21   :  { %3641 = shalt.err (!%p3638_p1)
}
  0x22   :  { %s3674_s0 = smov 512   ;;  %s3675_s5 = smov 32  }
  0x23   :  { %33 = dma.hbm_to_vmem [thread:$0]  %s4233_s1, 17920, %s28_s24, [#allocation7], %s3674_s0, %s3674_s0, %s3675_s5  }
  0x24   :  { %3664 = dma.done.wait [#allocation4], 1024  }
  0x25   :  { %3665 = vsyncadd [#allocation4], 4294966272 }
  0x26   :  { %3666 = dma.done.wait [#allocation7], 17920  }
  0x27   :  { %3667 = vsyncadd [#allocation7], 4294949376  ;;  %v3676_v0 = vmov 0.0   ;;  %v41_v1 = vld [vmem:[#allocation6 + $0x8] sm:$0xff]  ;;  %v3721_v2 = vld [vmem:[#allocation6] sm:$0xff]  ;;  %vm68_vm0 = vcmask 64512  }
  0x28   :  { %136 = vmatprep.mubr.f32.mxu1 %v3676_v0  ;;  %743 = vmatprep.mubr.f32.mxu0 %v3676_v0  ;;  %v46_v3 = vld [vmem:[#allocation3] sm:$0xff]  ;;  %v43_v4 = vld [vmem:[#allocation6 + $0x18] sm:$0xff]  ;;  %v3723_v5 = vld [vmem:[#allocation6 + $0x10] sm:$0xff]  ;;  %vm3678_vm2 = vmmov 0   ;;  %s3679_s1 = smov [#allocation8]  }
  0x29   :  { %72 = vmatprep.subr.mxu1 %v41_v1  ;;  %679 = vmatprep.subr.mxu0 %v41_v1  ;;  %v675_v6 = vld [vmem:[#allocation3 + $0x20] sm:$0xff]  ;;  %v219_v7 = vld [vmem:[#allocation3 + $0x8] sm:$0xff]  ;;  %v371_v8 = vld [vmem:[#allocation3 + $0x10] sm:$0xff]  ;;  %s2827_s8 = sshll.u32 %s3679_s1, 4  ;;  %s2828_s8 = int_to_ptr.vmem [resolvable:$true] %s2827_s8 }
  0x2a   :  { %73 = vmatpush1.msra.mxu1 %v3721_v2  ;;  %680 = vmatpush1.msra.mxu0 %v3721_v2  ;;  %v523_v9 = vld [vmem:[#allocation3 + $0x18] sm:$0xff]  ;;  %v827_v10 = vld [vmem:[#allocation3 + $0x28] sm:$0xff]  ;;  %v979_v11 = vld [vmem:[#allocation3 + $0x30] sm:$0xff]  ;;  %s3642_s9 = scalar_lea.vmem %s2828_s8, 128  ;;  %p3647_p3 = scmp.lt.s32.totalorder %s2828_s8, %s2828_s8 }
  0x2b   :  { %2837 = vmatmul.mubr.msk.f32.vlgmr.msra.gmra.mrb[0].mxu1 %vm68_vm0, %v46_v3  ;;  %143 = vmatprep.subr.mxu1 %v43_v4  ;;  %v1316_v12 = vld [vmem:[#allocation6 + $0x48] sm:$0xff]  ;;  %v1318_v14 = vld [vmem:[#allocation6 + $0x58] sm:$0xff]  ;;  %v1315_v17 = vld [vmem:[#allocation6 + $0x40] sm:$0xff]  ;;  %p3643_p2 = scmp.ne.s32.totalorder %s2828_s8, %s3642_s9  ;;  %p3648_p4 = scmp.lt.s32.totalorder %s3642_s9, %s3642_s9 }
  0x2c   :  { %144 = vmatpush1.msra.mxu1 %v3723_v5  ;;  %207 = vmatprep.mubr.f32.mxu1 %v3676_v0  ;;  %v1320_v13 = vld [vmem:[#allocation6 + $0x68] sm:$0xff]  ;;  %v1322_v16 = vld [vmem:[#allocation6 + $0x78] sm:$0xff]  ;;  %v1319_v18 = vld [vmem:[#allocation6 + $0x60] sm:$0xff] }
  0x2d   :  { %223 = vmatprep.subr.mxu1 %v41_v1  ;;  %831 = vmatprep.subr.mxu0 %v41_v1  ;;  %v3767_v15 = vpack.c.bf16 %v1320_v13, %v1316_v12  ;;  %v3771_v19 = vpack.c.bf16 %v1322_v16, %v1318_v14  ;;  %v3773_v20 = vpack.c.bf16 %v1319_v18, %v1315_v17  ;;  %v1317_v21 = vld [vmem:[#allocation6 + $0x50] sm:$0xff]  ;;  %v1131_v23 = vld [vmem:[#allocation3 + $0x38] sm:$0xff]  ;;  %v1324_v25 = vld [vmem:[#allocation6 + $0x88] sm:$0xff]  ;;  %p3649_p5 = por %p3648_p4, %p3647_p3 }
  0x2e   :  { %2845 = vmatmul.mubr.msk.f32.vlgmr.msra.gmra.mrb[0].mxu0 %vm68_vm0, %v675_v6  ;;  %v1321_v22 = vld [vmem:[#allocation6 + $0x70] sm:$0xff]  ;;  %v1328_v26 = vld [vmem:[#allocation6 + $0xa8] sm:$0xff]  ;;  %v1326_v27 = vld [vmem:[#allocation6 + $0x98] sm:$0xff] }
  0x2f   :  { %2838 = vmatmul.mubr.msk.f32.vlgmr.msra.gmra.mrb[2].mxu1 %vm68_vm0, %v46_v3  ;;  %832 = vmatpush1.msra.mxu0 %v3721_v2  ;;  %v3776_v24 = vpack.c.bf16 %v1321_v22, %v1317_v21  ;;  %v3782_v28 = vpack.c.bf16 %v1328_v26, %v1324_v25  ;;  %v1330_v29 = vld [vmem:[#allocation6 + $0xb8] sm:$0xff]  ;;  %v1323_v30 = vld [vmem:[#allocation6 + $0x80] sm:$0xff]  ;;  %v1325_v34 = vld [vmem:[#allocation6 + $0x90] sm:$0xff]  ;;  %p3650_p6 = pnand %p3649_p5, %p3643_p2 }
  0x30   :  { %224 = vmatpush1.msra.mxu1 %v3721_v2  ;;  %287 = vmatprep.mubr.f32.mxu1 %v3676_v0  ;;  %v1327_v31 = vld [vmem:[#allocation6 + $0xa0] sm:$0xff]  ;;  %v3785_v32 = vpack.c.bf16 %v1330_v29, %v1326_v27  ;;  %v1329_v35 = vld [vmem:[#allocation6 + $0xb0] sm:$0xff]  ;;  %v1332_v37 = vld [vmem:[#allocation6 + $0xc8] sm:$0xff] }
  0x31   :  { %294 = vmatprep.subr.mxu1 %v43_v4  ;;  %895 = vmatprep.mubr.f32.mxu0 %v3676_v0  ;;  %v3787_v33 = vpack.c.bf16 %v1327_v31, %v1323_v30  ;;  %v3791_v36 = vpack.c.bf16 %v1329_v35, %v1325_v34  ;;  %v1336_v38 = vld [vmem:[#allocation6 + $0xe8] sm:$0xff]  ;;  %v1334_v39 = vld [vmem:[#allocation6 + $0xd8] sm:$0xff]  ;;  %v1331_v42 = vld [vmem:[#allocation6 + $0xc0] sm:$0xff] }
  0x32   :  { %983 = vmatprep.subr.mxu0 %v41_v1  ;;  %2847 = vmatmul.mubr.msk.f32.vlgmr.msra.gmra.mrb[2].mxu0 %vm68_vm0, %v827_v10  ;;  %v3796_v40 = vpack.c.bf16 %v1336_v38, %v1332_v37  ;;  %v1338_v41 = vld [vmem:[#allocation6 + $0xf8] sm:$0xff]  ;;  %v1335_v43 = vld [vmem:[#allocation6 + $0xe0] sm:$0xff]  ;;  %v1333_v46 = vld [vmem:[#allocation6 + $0xd0] sm:$0xff] }
  0x33   :  { %2839 = vmatmul.mubr.msk.f32.vlgmr.msra.gmra.mrb[4].mxu1 %vm68_vm0, %v219_v7  ;;  %984 = vmatpush1.msra.mxu0 %v3721_v2  ;;  %v3799_v44 = vpack.c.bf16 %v1338_v41, %v1334_v39  ;;  %v3801_v45 = vpack.c.bf16 %v1335_v43, %v1331_v42  ;;  %v1337_v47 = vld [vmem:[#allocation6 + $0xf0] sm:$0xff]  ;;  %v1340_v49 = vld [vmem:[#allocation6 + $0x108] sm:$0xff]  ;;  %v1342_v51 = vld [vmem:[#allocation6 + $0x118] sm:$0xff] }
  0x34   :  { %295 = vmatpush1.msra.mxu1 %v3723_v5  ;;  %358 = vmatprep.mubr.f32.mxu1 %v3676_v0  ;;  %v3804_v48 = vpack.c.bf16 %v1337_v47, %v1333_v46  ;;  %v1344_v50 = vld [vmem:[#allocation6 + $0x128] sm:$0xff]  ;;  %v1346_v53 = vld [vmem:[#allocation6 + $0x138] sm:$0xff]  ;;  %v1339_v54 = vld [vmem:[#allocation6 + $0x100] sm:$0xff] }
  0x35   :  { %375 = vmatprep.subr.mxu1 %v41_v1  ;;  %1047 = vmatprep.mubr.f32.mxu0 %v3676_v0  ;;  %v3808_v52 = vpack.c.bf16 %v1344_v50, %v1340_v49  ;;  %v1343_v55 = vld [vmem:[#allocation6 + $0x120] sm:$0xff]  ;;  %v3811_v56 = vpack.c.bf16 %v1346_v53, %v1342_v51  ;;  %v1341_v58 = vld [vmem:[#allocation6 + $0x110] sm:$0xff]  ;;  %v1348_v61 = vld [vmem:[#allocation6 + $0x148] sm:$0xff] }
  0x36   :  { %1135 = vmatprep.subr.mxu0 %v41_v1  ;;  %2849 = vmatmul.mubr.msk.f32.vlgmr.msra.gmra.mrb[4].mxu0 %vm68_vm0, %v979_v11  ;;  %v3813_v57 = vpack.c.bf16 %v1343_v55, %v1339_v54  ;;  %v1345_v59 = vld [vmem:[#allocation6 + $0x130] sm:$0xff]  ;;  %v1352_v62 = vld [vmem:[#allocation6 + $0x168] sm:$0xff]  ;;  %v1350_v63 = vld [vmem:[#allocation6 + $0x158] sm:$0xff] }
  0x37   :  { %2840 = vmatmul.mubr.msk.f32.vlgmr.msra.gmra.mrb[6].mxu1 %vm68_vm0, %v219_v7  ;;  %1136 = vmatpush1.msra.mxu0 %v3721_v2  ;;  %v3816_v60 = vpack.c.bf16 %v1345_v59, %v1341_v58  ;;  %v1347_v3 = vld [vmem:[#allocation6 + $0x140] sm:$0xff]  ;;  %v1349_v7 = vld [vmem:[#allocation6 + $0x150] sm:$0xff]  ;;  %v1358_v12 = vld [vmem:[#allocation6 + $0x198] sm:$0xff] }
  0x38   :  { %376 = vmatpush1.msra.mxu1 %v3721_v2  ;;  %439 = vmatprep.mubr.f32.mxu1 %v3676_v0  ;;  %v1362_v14 = vld [vmem:[#allocation6 + $0x1b8] sm:$0xff]  ;;  %v1355_v16 = vld [vmem:[#allocation6 + $0x180] sm:$0xff]  ;;  %v1357_v22 = vld [vmem:[#allocation6 + $0x190] sm:$0xff] }
  0x39   :  { %446 = vmatprep.subr.mxu1 %v43_v4  ;;  %1199 = vmatprep.mubr.f32.mxu0 %v3676_v0  ;;  %v1359_v17 = vld [vmem:[#allocation6 + $0x1a0] sm:$0xff]  ;;  %v3835_v18 = vpack.c.bf16 %v1362_v14, %v1358_v12  ;;  %v1364_v25 = vld [vmem:[#allocation6 + $0x1c8] sm:$0xff]  ;;  %v1366_v29 = vld [vmem:[#allocation6 + $0x1d8] sm:$0xff] }
  0x3a   :  { %2907 = vmatprep.subr.bf16.mxu0 %v3767_v15  ;;  %2851 = vmatmul.mubr.msk.f32.vlgmr.msra.gmra.mrb[6].mxu0 %vm68_vm0, %v1131_v23  ;;  %v3837_v21 = vpack.c.bf16 %v1359_v17, %v1355_v16  ;;  %v1368_v27 = vld [vmem:[#allocation6 + $0x1e8] sm:$0xff]  ;;  %v1370_v30 = vld [vmem:[#allocation6 + $0x1f8] sm:$0xff]  ;;  %v1363_v35 = vld [vmem:[#allocation6 + $0x1c0] sm:$0xff] }
  0x3b   :  { %2841 = vmatmul.mubr.msk.f32.vlgmr.msra.gmra.mrb[8].mxu1 %vm68_vm0, %v371_v8  ;;  %2909 = vmatpush1.bf16.msra.mxu0 %v3773_v20  ;;  %v3843_v31 = vpack.c.bf16 %v1368_v27, %v1364_v25  ;;  %v3845_v34 = vpack.c.bf16 %v1370_v30, %v1366_v29  ;;  %v1367_v37 = vld [vmem:[#allocation6 + $0x1e0] sm:$0xff]  ;;  %v1365_v38 = vld [vmem:[#allocation6 + $0x1d0] sm:$0xff]  ;;  %v1372_v42 = vld [vmem:[#allocation6 + $0x208] sm:$0xff] }
  0x3c   :  { %447 = vmatpush1.msra.mxu1 %v3723_v5  ;;  %510 = vmatprep.mubr.f32.mxu1 %v3676_v0  ;;  %v3848_v39 = vpack.c.bf16 %v1367_v37, %v1363_v35  ;;  %v1369_v41 = vld [vmem:[#allocation6 + $0x1f0] sm:$0xff]  ;;  %v1376_v43 = vld [vmem:[#allocation6 + $0x228] sm:$0xff]  ;;  %v1374_v49 = vld [vmem:[#allocation6 + $0x218] sm:$0xff] }
  0x3d   :  { %527 = vmatprep.subr.mxu1 %v41_v1  ;;  %1443 = vmatprep.mubr.f32.mxu0 %v3676_v0  ;;  %v3820_v1 = vpack.c.bf16 %v1352_v62, %v1348_v61  ;;  %v3852_v46 = vpack.c.bf16 %v1369_v41, %v1365_v38  ;;  %v3854_v47 = vpack.c.bf16 %v1376_v43, %v1372_v42  ;;  %v1378_v50 = vld [vmem:[#allocation6 + $0x238] sm:$0xff]  ;;  %v1371_v51 = vld [vmem:[#allocation6 + $0x200] sm:$0xff]  ;;  %v1373_v55 = vld [vmem:[#allocation6 + $0x210] sm:$0xff]  ;;  %v48_v62 = vlaneseq }
  0x3e   :  { %2911 = vmatprep.subr.bf16.mxu0 %v3782_v28  ;;  %v3857_v53 = vpack.c.bf16 %v1378_v50, %v1374_v49  ;;  %v1375_v54 = vld [vmem:[#allocation6 + $0x220] sm:$0xff]  ;;  %v1377_v58 = vld [vmem:[#allocation6 + $0x230] sm:$0xff] }
  0x3f   :  { %2842 = vmatmul.mubr.msk.f32.vlgmr.msra.gmra.mrb[10].mxu1 %vm68_vm0, %v371_v8  ;;  %2913 = vmatpush1.bf16.msra.mxu0 %v3787_v33  ;;  %v1353_v8 = vld [vmem:[#allocation6 + $0x170] sm:$0xff]  ;;  %v3860_v59 = vpack.c.bf16 %v1375_v54, %v1371_v51  ;;  %v3864_v61 = vpack.c.bf16 %v1377_v58, %v1373_v55  ;;  %v1283_v49 = vand.u32 127, %v48_v62 }
  0x40   :  { %528 = vmatpush1.msra.mxu1 %v3721_v2  ;;  %591 = vmatprep.mubr.f32.mxu1 %v3676_v0  ;;  %v1354_v2 = vld [vmem:[#allocation6 + $0x178] sm:$0xff] }
  0x41   :  { %598 = vmatprep.subr.mxu1 %v43_v4  ;;  %2915 = vmatprep.subr.bf16.mxu0 %v3796_v40  ;;  %vm1284_vm1 = vcmp.lt.s32.totalorder %v1283_v49, 64 }
  0x43   :  { %2843 = vmatmul.mubr.msk.f32.vlgmr.msra.gmra.mrb[12].mxu1 %vm68_vm0, %v523_v9  ;;  %2917 = vmatpush1.bf16.msra.mxu0 %v3801_v45 }
  0x44   :  { %599 = vmatpush1.msra.mxu1 %v3723_v5  ;;  %662 = vmatprep.mubr.f32.mxu1 %v3676_v0 }
  0x45   :  { %750 = vmatprep.subr.mxu1 %v43_v4  ;;  %2919 = vmatprep.subr.bf16.mxu0 %v3808_v52 }
  0x47   :  { %2844 = vmatmul.mubr.msk.f32.vlgmr.msra.gmra.mrb[14].mxu1 %vm68_vm0, %v523_v9  ;;  %2921 = vmatpush1.bf16.msra.mxu0 %v3813_v57  ;;  %v3828_v9 = vpack.c.bf16 %v1353_v8, %v1349_v7 }
  0x48   :  { %751 = vmatpush1.msra.mxu1 %v3723_v5  ;;  %814 = vmatprep.mubr.f32.mxu1 %v3676_v0 }
  0x49   :  { %902 = vmatprep.subr.mxu1 %v43_v4  ;;  %2923 = vmatprep.subr.bf16.mxu0 %v3820_v1 }
  0x4b   :  { %2846 = vmatmul.mubr.msk.f32.vlgmr.msra.gmra.mrb[16].mxu1 %vm68_vm0, %v675_v6 }
  0x4c   :  { %903 = vmatpush1.msra.mxu1 %v3723_v5  ;;  %966 = vmatprep.mubr.f32.mxu1 %v3676_v0 }
  0x4d   :  { %1054 = vmatprep.subr.mxu1 %v43_v4 }
  0x4f   :  { %2848 = vmatmul.mubr.msk.f32.vlgmr.msra.gmra.mrb[18].mxu1 %vm68_vm0, %v827_v10  ;;  %v1356_v10 = vld [vmem:[#allocation6 + $0x188] sm:$0xff] }
  0x50   :  { %1055 = vmatpush1.msra.mxu1 %v3723_v5  ;;  %1118 = vmatprep.mubr.f32.mxu1 %v3676_v0 }
  0x51   :  { %1206 = vmatprep.subr.mxu1 %v43_v4  ;;  %v1351_v4 = vld [vmem:[#allocation6 + $0x160] sm:$0xff] }
  0x52   :  { %v3825_v6 = vpack.c.bf16 %v1351_v4, %v1347_v3  ;;  %v45_v3 = vld [vmem:[#allocation6 + $0x20] ss:$8 sm:$0xf] }
  0x53   :  { %2850 = vmatmul.mubr.msk.f32.vlgmr.msra.gmra.mrb[20].mxu1 %vm68_vm0, %v979_v11  ;;  %v1360_v11 = vld [vmem:[#allocation6 + $0x1a8] sm:$0xff] }
  0x54   :  { %1207 = vmatpush1.msra.mxu1 %v3723_v5  ;;  %1270 = vmatprep.mubr.f32.mxu1 %v3676_v0  ;;  %v3823_v5 = vpack.c.bf16 %v1354_v2, %v1350_v63  ;;  %v3832_v13 = vpack.c.bf16 %v1360_v11, %v1356_v10  ;;  %v3871_v63 = vshrl.u32 %v48_v62, 7 }
  0x55   :  { %2939 = vmatprep.subr.bf16.mxu1 %v3771_v19  ;;  %2925 = vmatpush1.bf16.msra.mxu0 %v3825_v6 }
  0x56   :  { %2927 = vmatprep.subr.bf16.mxu0 %v3832_v13  ;;  %v50_v2 = vsub.s32 0, %v3871_v63  ;;  %v54_v4 = vsub.s32 1, %v3871_v63  ;;  %v4236_v10 = vsub.s32 3, %v3871_v63  ;;  %v4235_v16 = vsub.s32 2, %v3871_v63 }
  0x57   :  { %2852 = vmatmul.mubr.msk.f32.vlgmr.msra.gmra.mrb[22].mxu1 %vm68_vm0, %v1131_v23  ;;  %v1361_v23 = vld [vmem:[#allocation6 + $0x1b0] sm:$0xff] }
  0x58   :  { %2941 = vmatpush1.bf16.msra.mxu1 %v3776_v24  ;;  %1514 = vmatprep.mubr.f32.mxu1 %v3676_v0  ;;  %v3840_v26 = vpack.c.bf16 %v1361_v23, %v1357_v22  ;;  %v3877_v7 = vrot.slane %v45_v3, %v50_v2  ;;  %v3881_v8 = vrot.slane %v45_v3, %v54_v4 }
  0x59   :  { %2943 = vmatprep.subr.bf16.mxu1 %v3785_v32  ;;  %2929 = vmatpush1.bf16.msra.mxu0 %v3837_v21  ;;  %v3889_v22 = vrot.slane %v45_v3, %v4236_v10  ;;  %v3893_v29 = vrot.slane %v45_v3, %v4235_v16 }
  0x5a   :  { %2931 = vmatprep.subr.bf16.mxu0 %v3843_v31 }
  0x5c   :  { %2945 = vmatpush1.bf16.msra.mxu1 %v3791_v36 }
  0x5d   :  { %2947 = vmatprep.subr.bf16.mxu1 %v3799_v44  ;;  %2933 = vmatpush1.bf16.msra.mxu0 %v3848_v39 }
  0x5e   :  { %2935 = vmatprep.subr.bf16.mxu0 %v3854_v47 }
  0x60   :  { %2949 = vmatpush1.bf16.msra.mxu1 %v3804_v48 }
  0x61   :  { %2951 = vmatprep.subr.bf16.mxu1 %v3811_v56  ;;  %2937 = vmatpush1.bf16.msra.mxu0 %v3860_v59 }
  0x62   :  { %2971 = vmatprep.subr.bf16.mxu0 %v3767_v15 }
  0x64   :  { %2953 = vmatpush1.bf16.msra.mxu1 %v3816_v60 }
  0x65   :  { %2955 = vmatprep.subr.bf16.mxu1 %v3823_v5 }
  0x68   :  { %2957 = vmatpush1.bf16.msra.mxu1 %v3828_v9 }
  0x69   :  { %2959 = vmatprep.subr.bf16.mxu1 %v3835_v18 }
  0x6c   :  { %2961 = vmatpush1.bf16.msra.mxu1 %v3840_v26 }
  0x6d   :  { %2963 = vmatprep.subr.bf16.mxu1 %v3845_v34 }
  0x70   :  { %2965 = vmatpush1.bf16.msra.mxu1 %v3852_v46 }
  0x71   :  { %2967 = vmatprep.subr.bf16.mxu1 %v3857_v53 }
  0x74   :  { %2969 = vmatpush1.bf16.msra.mxu1 %v3864_v61 }
  0x75   :  { %3003 = vmatprep.subr.bf16.mxu1 %v3771_v19 }
  0xfe   :  { %v138_v11 = vpop.f32.mrb[0].mxu1 }
  0xff   :  { %v139_v12 = vadd.f32 %v138_v11, %v3877_v7  ;;  %v140_v14 = vpop.f32.mrb[1].mxu1 }
 0x100   :  { %v141_v17 = vadd.f32 %v140_v14, %v3881_v8 }
 0x101   :  { %v1291_v23 = vmul.f32 0.5, %v139_v12 }
 0x102   :  { %v1292_v25 = vmul.f32 0.5, %v141_v17  ;;  %v209_v27 = vpop.f32.mrb[2].mxu1 }
 0x103   :  { %3508 = vtanh.f32 %v1291_v23  ;;  %v211_v30 = vpop.f32.mrb[3].mxu1  ;;  %v210_v38 = vadd.f32 %v209_v27, %v3893_v29  ;;  %v2853_v23 = vsel %vm1284_vm1, 1.0, %v3676_v0 }
 0x104   :  { %3510 = vtanh.f32 %v1292_v25  ;;  %v212_v35 = vadd.f32 %v211_v30, %v3889_v22 }
 0x105   :  { %v1293_v42 = vmul.f32 0.5, %v210_v38 }
 0x106   :  { %3512 = vtanh.f32 %v212_v35  ;;  %v3896_v37 = vpop.f32.mrb[4].mxu1 }
 0x107   :  { %v3899_v41 = vpop.f32.mrb[5].mxu1  ;;  %3514 = vtanh.f32 %v1293_v42  ;;  %v290_v49 = vadd.f32 %v3896_v37, %v3877_v7 }
 0x10d   :  { %v3509_v43 = vpop.eup %3508 }
 0x10e   :  { %v3511_v50 = vpop.eup %3510  ;;  %v1297_v51 = vmul.f32 0.5, %v3509_v43  ;;  %v3901_v54 = vpop.f32.mrb[8].mxu1 }
 0x10f   :  { %v1298_v55 = vmul.f32 0.5, %v3511_v50  ;;  %v3903_v58 = vpop.f32.mrb[9].mxu1 }
 0x110   :  { %v3513_v3 = vpop.eup %3512  ;;  %v1300_v11 = vadd.f32 0.5, %v1297_v51 }
 0x111   :  { %v1301_v12 = vadd.f32 0.5, %v1298_v55  ;;  %v3515_v35 = vpop.eup %3514  ;;  %v292_v55 = vadd.f32 %v3899_v41, %v3881_v8 }
 0x112   :  { %v1305_v14 = vmul.f32 %v3513_v3, %v1300_v11  ;;  %v1299_v38 = vmul.f32 0.5, %v3515_v35 }
 0x113   :  { %v1304_v17 = vmul.f32 0.0, %v1301_v12 }
 0x114   :  { %v1302_v42 = vadd.f32 0.5, %v1299_v38 }
 0x115   :  { %v1306_v25 = vadd.f32 %v1305_v14, %v1304_v17 }
 0x116   :  { %v3906_v27 = vpop.f32.mrb[12].mxu1 }
 0x117   :  { %3516 = vtanh.f32 %v1306_v25  ;;  %v3908_v62 = vpop.f32.mrb[13].mxu1  ;;  %v3910_v30 = vmul.f32 %v2853_v23, %v1306_v25 }
 0x121   :  { %v3517_v43 = vpop.eup %3516 }
 0x122   :  { %v1308_v50 = vmul.f32 %v3517_v43, %v1302_v42 }
 0x124   :  { %v1309_v51 = vmul.f32 %v2853_v23, %v1308_v50 }
 0x126   :  { %1444 = vmatmul.mubr.f32.vlgmr.msra.gmra.mrb[8].mxu0 %v1309_v51  ;;  %1515 = vmatmul.mubr.f32.vlgmr.msra.gmra.mrb[6].mxu1 %v1309_v51 }
 0x127   :  { %2973 = vmatpush1.bf16.msra.mxu0 %v3773_v20  ;;  %3005 = vmatpush1.bf16.msra.mxu1 %v3776_v24 }
 0x128   :  { %2975 = vmatprep.subr.bf16.mxu0 %v3782_v28  ;;  %3007 = vmatprep.subr.bf16.mxu1 %v3785_v32 }
 0x129   :  { %1611 = vmatprep.mubr.f32.mxu0 %v3676_v0  ;;  %1682 = vmatprep.mubr.f32.mxu1 %v3676_v0 }
 0x12b   :  { %2977 = vmatpush1.bf16.msra.mxu0 %v3787_v33  ;;  %3009 = vmatpush1.bf16.msra.mxu1 %v3791_v36 }
 0x12c   :  { %2979 = vmatprep.subr.bf16.mxu0 %v3796_v40  ;;  %3011 = vmatprep.subr.bf16.mxu1 %v3799_v44 }
 0x12f   :  { %2981 = vmatpush1.bf16.msra.mxu0 %v3801_v45  ;;  %3013 = vmatpush1.bf16.msra.mxu1 %v3804_v48 }
 0x130   :  { %2983 = vmatprep.subr.bf16.mxu0 %v3808_v52  ;;  %3015 = vmatprep.subr.bf16.mxu1 %v3811_v56 }
 0x133   :  { %2985 = vmatpush1.bf16.msra.mxu0 %v3813_v57  ;;  %3017 = vmatpush1.bf16.msra.mxu1 %v3816_v60 }
 0x134   :  { %2987 = vmatprep.subr.bf16.mxu0 %v3820_v1  ;;  %3019 = vmatprep.subr.bf16.mxu1 %v3823_v5 }
 0x137   :  { %2989 = vmatpush1.bf16.msra.mxu0 %v3825_v6  ;;  %3021 = vmatpush1.bf16.msra.mxu1 %v3828_v9 }
 0x138   :  { %2991 = vmatprep.subr.bf16.mxu0 %v3832_v13  ;;  %3023 = vmatprep.subr.bf16.mxu1 %v3835_v18 }
 0x13b   :  { %2993 = vmatpush1.bf16.msra.mxu0 %v3837_v21  ;;  %3025 = vmatpush1.bf16.msra.mxu1 %v3840_v26 }
 0x13c   :  { %2995 = vmatprep.subr.bf16.mxu0 %v3843_v31  ;;  %3027 = vmatprep.subr.bf16.mxu1 %v3845_v34 }
 0x13f   :  { %2997 = vmatpush1.bf16.msra.mxu0 %v3848_v39  ;;  %3029 = vmatpush1.bf16.msra.mxu1 %v3852_v46 }
 0x140   :  { %2999 = vmatprep.subr.bf16.mxu0 %v3854_v47  ;;  %3031 = vmatprep.subr.bf16.mxu1 %v3857_v53 }
 0x143   :  { %3001 = vmatpush1.bf16.msra.mxu0 %v3860_v59  ;;  %3033 = vmatpush1.bf16.msra.mxu1 %v3864_v61 }
 0x144   :  { %3035 = vmatprep.subr.bf16.mxu0 %v3767_v15  ;;  %3067 = vmatprep.subr.bf16.mxu1 %v3771_v19 }
 0x1f9   :  { %v1445_v3 = vpop.f32.mrb[8].mxu0  ;;  %v1516_v11 = vpop.f32.mrb[6].mxu1 }
 0x1fa   :  { %v1521_v12 = vadd.f32 %v1445_v3, %v290_v49  ;;  %v1447_v14 = vpop.f32.mrb[9].mxu0  ;;  %v1518_v17 = vpop.f32.mrb[7].mxu1  ;;  %v3446_v42 = vadd.f32 %v1516_v11, %v3893_v29 }
 0x1fb   :  { %v1522_v23 = vadd.f32 %v1447_v14, %v292_v55  ;;  %v3447_v38 = vadd.f32 %v1518_v17, %v3889_v22 }
 0x1fc   :  { %v1525_v25 = vmul.f32 0.5, %v1521_v12  ;;  %v1527_v43 = vmul.f32 0.5, %v3446_v42 }
 0x1fd   :  { %v1526_v35 = vmul.f32 0.5, %v1522_v23 }
 0x1fe   :  { %3518 = vtanh.f32 %v1525_v25 }
 0x1ff   :  { %3520 = vtanh.f32 %v1526_v35 }
 0x200   :  { %3522 = vtanh.f32 %v3447_v38 }
 0x201   :  { %3524 = vtanh.f32 %v1527_v43 }
 0x208   :  { %v3519_v37 = vpop.eup %3518 }
 0x209   :  { %v1531_v50 = vmul.f32 0.5, %v3519_v37  ;;  %v3521_v51 = vpop.eup %3520 }
 0x20a   :  { %v1532_v16 = vmul.f32 0.5, %v3521_v51  ;;  %v3523_v49 = vpop.eup %3522 }
 0x20b   :  { %v1534_v41 = vadd.f32 0.5, %v1531_v50  ;;  %v3525_v14 = vpop.eup %3524 }
 0x20c   :  { %v1535_v3 = vadd.f32 0.5, %v1532_v16  ;;  %v1533_v17 = vmul.f32 0.5, %v3525_v14  ;;  %v444_v16 = vadd.f32 %v3903_v58, %v3881_v8 }
 0x20d   :  { %v1539_v10 = vmul.f32 %v3523_v49, %v1534_v41 }
 0x20e   :  { %v1538_v55 = vmul.f32 %v1535_v3, %v3910_v30  ;;  %v1536_v23 = vadd.f32 0.5, %v1533_v17 }
 0x210   :  { %v3953_v12 = vadd.f32 %v1539_v10, %v1538_v55  ;;  %v442_v10 = vadd.f32 %v3901_v54, %v3877_v7 }
 0x212   :  { %3526 = vtanh.f32 %v3953_v12 }
 0x21c   :  { %v3527_v11 = vpop.eup %3526 }
 0x21d   :  { %v1542_v25 = vmul.f32 %v3527_v11, %v1536_v23 }
 0x21f   :  { %1612 = vmatmul.mubr.f32.vlgmr.msra.gmra.mrb[10].mxu0 %v1542_v25  ;;  %1683 = vmatmul.mubr.f32.vlgmr.msra.gmra.mrb[10].mxu1 %v1542_v25 }
 0x220   :  { %3037 = vmatpush1.bf16.msra.mxu0 %v3773_v20  ;;  %3069 = vmatpush1.bf16.msra.mxu1 %v3776_v24 }
 0x221   :  { %3039 = vmatprep.subr.bf16.mxu0 %v3782_v28  ;;  %3071 = vmatprep.subr.bf16.mxu1 %v3785_v32 }
 0x222   :  { %1779 = vmatprep.mubr.f32.mxu0 %v3676_v0  ;;  %1850 = vmatprep.mubr.f32.mxu1 %v3676_v0 }
 0x224   :  { %3041 = vmatpush1.bf16.msra.mxu0 %v3787_v33  ;;  %3073 = vmatpush1.bf16.msra.mxu1 %v3791_v36 }
 0x225   :  { %3043 = vmatprep.subr.bf16.mxu0 %v3796_v40  ;;  %3075 = vmatprep.subr.bf16.mxu1 %v3799_v44 }
 0x228   :  { %3045 = vmatpush1.bf16.msra.mxu0 %v3801_v45  ;;  %3077 = vmatpush1.bf16.msra.mxu1 %v3804_v48 }
 0x229   :  { %3047 = vmatprep.subr.bf16.mxu0 %v3808_v52  ;;  %3079 = vmatprep.subr.bf16.mxu1 %v3811_v56 }
 0x22c   :  { %3049 = vmatpush1.bf16.msra.mxu0 %v3813_v57  ;;  %3081 = vmatpush1.bf16.msra.mxu1 %v3816_v60 }
 0x22d   :  { %3051 = vmatprep.subr.bf16.mxu0 %v3820_v1  ;;  %3083 = vmatprep.subr.bf16.mxu1 %v3823_v5 }
 0x230   :  { %3053 = vmatpush1.bf16.msra.mxu0 %v3825_v6  ;;  %3085 = vmatpush1.bf16.msra.mxu1 %v3828_v9 }
 0x231   :  { %3055 = vmatprep.subr.bf16.mxu0 %v3832_v13  ;;  %3087 = vmatprep.subr.bf16.mxu1 %v3835_v18 }
 0x234   :  { %3057 = vmatpush1.bf16.msra.mxu0 %v3837_v21  ;;  %3089 = vmatpush1.bf16.msra.mxu1 %v3840_v26 }
 0x235   :  { %3059 = vmatprep.subr.bf16.mxu0 %v3843_v31  ;;  %3091 = vmatprep.subr.bf16.mxu1 %v3845_v34 }
 0x238   :  { %3061 = vmatpush1.bf16.msra.mxu0 %v3848_v39  ;;  %3093 = vmatpush1.bf16.msra.mxu1 %v3852_v46 }
 0x239   :  { %3063 = vmatprep.subr.bf16.mxu0 %v3854_v47  ;;  %3095 = vmatprep.subr.bf16.mxu1 %v3857_v53 }
 0x23c   :  { %3065 = vmatpush1.bf16.msra.mxu0 %v3860_v59  ;;  %3097 = vmatpush1.bf16.msra.mxu1 %v3864_v61 }
 0x23d   :  { %3099 = vmatprep.subr.bf16.mxu0 %v3767_v15  ;;  %3131 = vmatprep.subr.bf16.mxu1 %v3771_v19 }
 0x2f2   :  { %v1613_v30 = vpop.f32.mrb[10].mxu0  ;;  %v1684_v35 = vpop.f32.mrb[10].mxu1 }
 0x2f3   :  { %v1689_v38 = vadd.f32 %v1613_v30, %v442_v10  ;;  %v1615_v42 = vpop.f32.mrb[11].mxu0  ;;  %v1686_v43 = vpop.f32.mrb[11].mxu1  ;;  %v3452_v49 = vadd.f32 %v1684_v35, %v3893_v29 }
 0x2f4   :  { %v1690_v37 = vadd.f32 %v1615_v42, %v444_v16  ;;  %v3453_v41 = vadd.f32 %v1686_v43, %v3889_v22 }
 0x2f5   :  { %v1693_v50 = vmul.f32 0.5, %v1689_v38  ;;  %v1695_v3 = vmul.f32 0.5, %v3452_v49 }
 0x2f6   :  { %v1694_v51 = vmul.f32 0.5, %v1690_v37  ;;  %v596_v37 = vadd.f32 %v3908_v62, %v3881_v8 }
 0x2f7   :  { %3528 = vtanh.f32 %v1693_v50 }
 0x2f8   :  { %3530 = vtanh.f32 %v1694_v51 }
 0x2f9   :  { %3532 = vtanh.f32 %v3453_v41 }
 0x2fa   :  { %3534 = vtanh.f32 %v1695_v3 }
 0x301   :  { %v3529_v54 = vpop.eup %3528 }
 0x302   :  { %v1699_v55 = vmul.f32 0.5, %v3529_v54  ;;  %v3531_v14 = vpop.eup %3530 }
 0x303   :  { %v1700_v17 = vmul.f32 0.5, %v3531_v14  ;;  %v3533_v23 = vpop.eup %3532 }
 0x304   :  { %v1702_v58 = vadd.f32 0.5, %v1699_v55  ;;  %v3535_v30 = vpop.eup %3534 }
 0x305   :  { %v1703_v11 = vadd.f32 0.5, %v1700_v17  ;;  %v1701_v38 = vmul.f32 0.5, %v3535_v30 }
 0x306   :  { %v1707_v25 = vmul.f32 %v3533_v23, %v1702_v58 }
 0x307   :  { %v1706_v10 = vmul.f32 %v1703_v11, %v3953_v12  ;;  %v1704_v42 = vadd.f32 0.5, %v1701_v38  ;;  %v594_v12 = vadd.f32 %v3906_v27, %v3877_v7 }
 0x309   :  { %v3997_v16 = vadd.f32 %v1707_v25, %v1706_v10 }
 0x30b   :  { %3536 = vtanh.f32 %v3997_v16 }
 0x315   :  { %v3537_v35 = vpop.eup %3536 }
 0x316   :  { %v1710_v43 = vmul.f32 %v3537_v35, %v1704_v42 }
 0x318   :  { %1780 = vmatmul.mubr.f32.vlgmr.msra.gmra.mrb[12].mxu0 %v1710_v43  ;;  %1851 = vmatmul.mubr.f32.vlgmr.msra.gmra.mrb[14].mxu1 %v1710_v43 }
 0x319   :  { %3101 = vmatpush1.bf16.msra.mxu0 %v3773_v20  ;;  %3133 = vmatpush1.bf16.msra.mxu1 %v3776_v24 }
 0x31a   :  { %3103 = vmatprep.subr.bf16.mxu0 %v3782_v28  ;;  %3135 = vmatprep.subr.bf16.mxu1 %v3785_v32 }
 0x31b   :  { %1947 = vmatprep.mubr.f32.mxu0 %v3676_v0  ;;  %2018 = vmatprep.mubr.f32.mxu1 %v3676_v0 }
 0x31d   :  { %3105 = vmatpush1.bf16.msra.mxu0 %v3787_v33  ;;  %3137 = vmatpush1.bf16.msra.mxu1 %v3791_v36 }
 0x31e   :  { %3107 = vmatprep.subr.bf16.mxu0 %v3796_v40  ;;  %3139 = vmatprep.subr.bf16.mxu1 %v3799_v44 }
 0x321   :  { %3109 = vmatpush1.bf16.msra.mxu0 %v3801_v45  ;;  %3141 = vmatpush1.bf16.msra.mxu1 %v3804_v48 }
 0x322   :  { %3111 = vmatprep.subr.bf16.mxu0 %v3808_v52  ;;  %3143 = vmatprep.subr.bf16.mxu1 %v3811_v56 }
 0x325   :  { %3113 = vmatpush1.bf16.msra.mxu0 %v3813_v57  ;;  %3145 = vmatpush1.bf16.msra.mxu1 %v3816_v60 }
 0x326   :  { %3115 = vmatprep.subr.bf16.mxu0 %v3820_v1  ;;  %3147 = vmatprep.subr.bf16.mxu1 %v3823_v5 }
 0x329   :  { %3117 = vmatpush1.bf16.msra.mxu0 %v3825_v6  ;;  %3149 = vmatpush1.bf16.msra.mxu1 %v3828_v9 }
 0x32a   :  { %3119 = vmatprep.subr.bf16.mxu0 %v3832_v13  ;;  %3151 = vmatprep.subr.bf16.mxu1 %v3835_v18 }
 0x32d   :  { %3121 = vmatpush1.bf16.msra.mxu0 %v3837_v21  ;;  %3153 = vmatpush1.bf16.msra.mxu1 %v3840_v26 }
 0x32e   :  { %3123 = vmatprep.subr.bf16.mxu0 %v3843_v31  ;;  %3155 = vmatprep.subr.bf16.mxu1 %v3845_v34 }
 0x331   :  { %3125 = vmatpush1.bf16.msra.mxu0 %v3848_v39  ;;  %3157 = vmatpush1.bf16.msra.mxu1 %v3852_v46 }
 0x332   :  { %3127 = vmatprep.subr.bf16.mxu0 %v3854_v47  ;;  %3159 = vmatprep.subr.bf16.mxu1 %v3857_v53 }
 0x335   :  { %3129 = vmatpush1.bf16.msra.mxu0 %v3860_v59  ;;  %3161 = vmatpush1.bf16.msra.mxu1 %v3864_v61 }
 0x336   :  { %3163 = vmatprep.subr.bf16.mxu0 %v3767_v15  ;;  %3195 = vmatprep.subr.bf16.mxu1 %v3771_v19 }
 0x3eb   :  { %v1781_v50 = vpop.f32.mrb[12].mxu0  ;;  %v1852_v51 = vpop.f32.mrb[14].mxu1 }
 0x3ec   :  { %v1857_v41 = vadd.f32 %v1781_v50, %v594_v12  ;;  %v1783_v49 = vpop.f32.mrb[13].mxu0  ;;  %v1854_v3 = vpop.f32.mrb[15].mxu1  ;;  %v3458_v17 = vadd.f32 %v1852_v51, %v3893_v29 }
 0x3ed   :  { %v1858_v54 = vadd.f32 %v1783_v49, %v596_v37  ;;  %v3459_v58 = vadd.f32 %v1854_v3, %v3889_v22 }
 0x3ee   :  { %v1861_v55 = vmul.f32 0.5, %v1857_v41  ;;  %v1863_v23 = vmul.f32 0.5, %v3458_v17 }
 0x3ef   :  { %v1862_v14 = vmul.f32 0.5, %v1858_v54 }
 0x3f0   :  { %3538 = vtanh.f32 %v1861_v55 }
 0x3f1   :  { %3540 = vtanh.f32 %v1862_v14 }
 0x3f2   :  { %3542 = vtanh.f32 %v3459_v58 }
 0x3f3   :  { %3544 = vtanh.f32 %v1863_v23 }
 0x3fa   :  { %v3539_v27 = vpop.eup %3538 }
 0x3fb   :  { %v1867_v11 = vmul.f32 0.5, %v3539_v27  ;;  %v3541_v25 = vpop.eup %3540 }
 0x3fc   :  { %v1868_v10 = vmul.f32 0.5, %v3541_v25  ;;  %v3543_v30 = vpop.eup %3542 }
 0x3fd   :  { %v1870_v62 = vadd.f32 0.5, %v1867_v11  ;;  %v3545_v12 = vpop.eup %3544 }
 0x3fe   :  { %v1871_v38 = vadd.f32 0.5, %v1868_v10  ;;  %v1869_v37 = vmul.f32 0.5, %v3545_v12 }
 0x3ff   :  { %v1875_v42 = vmul.f32 %v3543_v30, %v1870_v62 }
 0x400   :  { %v1874_v35 = vmul.f32 %v1871_v38, %v3997_v16  ;;  %v1872_v50 = vadd.f32 0.5, %v1869_v37 }
 0x402   :  { %v4041_v43 = vadd.f32 %v1875_v42, %v1874_v35 }
 0x404   :  { %3546 = vtanh.f32 %v4041_v43 }
 0x40e   :  { %v3547_v51 = vpop.eup %3546 }
 0x40f   :  { %v1878_v41 = vmul.f32 %v3547_v51, %v1872_v50 }
 0x411   :  { %1948 = vmatmul.mubr.f32.vlgmr.msra.gmra.mrb[0].mxu0 %v1878_v41  ;;  %2019 = vmatmul.mubr.f32.vlgmr.msra.gmra.mrb[16].mxu1 %v1878_v41 }
 0x412   :  { %3165 = vmatpush1.bf16.msra.mxu0 %v3773_v20  ;;  %3197 = vmatpush1.bf16.msra.mxu1 %v3776_v24 }
 0x413   :  { %3167 = vmatprep.subr.bf16.mxu0 %v3782_v28  ;;  %3199 = vmatprep.subr.bf16.mxu1 %v3785_v32 }
 0x414   :  { %2115 = vmatprep.mubr.f32.mxu0 %v3676_v0  ;;  %2186 = vmatprep.mubr.f32.mxu1 %v3676_v0 }
 0x416   :  { %3169 = vmatpush1.bf16.msra.mxu0 %v3787_v33  ;;  %3201 = vmatpush1.bf16.msra.mxu1 %v3791_v36 }
 0x417   :  { %3171 = vmatprep.subr.bf16.mxu0 %v3796_v40  ;;  %3203 = vmatprep.subr.bf16.mxu1 %v3799_v44 }
 0x41a   :  { %3173 = vmatpush1.bf16.msra.mxu0 %v3801_v45  ;;  %3205 = vmatpush1.bf16.msra.mxu1 %v3804_v48 }
 0x41b   :  { %3175 = vmatprep.subr.bf16.mxu0 %v3808_v52  ;;  %3207 = vmatprep.subr.bf16.mxu1 %v3811_v56 }
 0x41e   :  { %3177 = vmatpush1.bf16.msra.mxu0 %v3813_v57  ;;  %3209 = vmatpush1.bf16.msra.mxu1 %v3816_v60 }
 0x41f   :  { %3179 = vmatprep.subr.bf16.mxu0 %v3820_v1  ;;  %3211 = vmatprep.subr.bf16.mxu1 %v3823_v5 }
 0x422   :  { %3181 = vmatpush1.bf16.msra.mxu0 %v3825_v6  ;;  %3213 = vmatpush1.bf16.msra.mxu1 %v3828_v9 }
 0x423   :  { %3183 = vmatprep.subr.bf16.mxu0 %v3832_v13  ;;  %3215 = vmatprep.subr.bf16.mxu1 %v3835_v18 }
 0x426   :  { %3185 = vmatpush1.bf16.msra.mxu0 %v3837_v21  ;;  %3217 = vmatpush1.bf16.msra.mxu1 %v3840_v26 }
 0x427   :  { %3187 = vmatprep.subr.bf16.mxu0 %v3843_v31  ;;  %3219 = vmatprep.subr.bf16.mxu1 %v3845_v34 }
 0x42a   :  { %3189 = vmatpush1.bf16.msra.mxu0 %v3848_v39  ;;  %3221 = vmatpush1.bf16.msra.mxu1 %v3852_v46 }
 0x42b   :  { %3191 = vmatprep.subr.bf16.mxu0 %v3854_v47  ;;  %3223 = vmatprep.subr.bf16.mxu1 %v3857_v53 }
 0x42e   :  { %3193 = vmatpush1.bf16.msra.mxu0 %v3860_v59  ;;  %3225 = vmatpush1.bf16.msra.mxu1 %v3864_v61 }
 0x42f   :  { %3227 = vmatprep.subr.bf16.mxu0 %v3767_v15  ;;  %3259 = vmatprep.subr.bf16.mxu1 %v3771_v19 }
 0x4e4   :  { %v1949_v16 = vpop.f32.mrb[0].mxu0  ;;  %v2020_v49 = vpop.f32.mrb[16].mxu1 }
 0x4e5   :  { %v3460_v3 = vadd.f32 %v1949_v16, %v3877_v7  ;;  %v1951_v54 = vpop.f32.mrb[1].mxu0  ;;  %v2022_v55 = vpop.f32.mrb[17].mxu1  ;;  %v3462_v27 = vadd.f32 %v2020_v49, %v3893_v29 }
 0x4e6   :  { %v3461_v14 = vadd.f32 %v1951_v54, %v3881_v8  ;;  %v3463_v23 = vadd.f32 %v2022_v55, %v3889_v22 }
 0x4e7   :  { %v2029_v58 = vmul.f32 0.5, %v3460_v3  ;;  %v2031_v11 = vmul.f32 0.5, %v3462_v27 }
 0x4e8   :  { %v2030_v17 = vmul.f32 0.5, %v3461_v14 }
 0x4e9   :  { %3548 = vtanh.f32 %v2029_v58 }
 0x4ea   :  { %3550 = vtanh.f32 %v2030_v17 }
 0x4eb   :  { %3552 = vtanh.f32 %v3463_v23 }
 0x4ec   :  { %3554 = vtanh.f32 %v2031_v11 }
 0x4f3   :  { %v3549_v25 = vpop.eup %3548 }
 0x4f4   :  { %v2035_v62 = vmul.f32 0.5, %v3549_v25  ;;  %v3551_v10 = vpop.eup %3550 }
 0x4f5   :  { %v2036_v38 = vmul.f32 0.5, %v3551_v10  ;;  %v3553_v42 = vpop.eup %3552 }
 0x4f6   :  { %v2038_v30 = vadd.f32 0.5, %v2035_v62  ;;  %v3555_v51 = vpop.eup %3554 }
 0x4f7   :  { %v2039_v35 = vadd.f32 0.5, %v2036_v38  ;;  %v2037_v41 = vmul.f32 0.5, %v3555_v51 }
 0x4f8   :  { %v2043_v12 = vmul.f32 %v3553_v42, %v2038_v30 }
 0x4f9   :  { %v2042_v37 = vmul.f32 %v2039_v35, %v4041_v43  ;;  %v2040_v16 = vadd.f32 0.5, %v2037_v41 }
 0x4fb   :  { %v4083_v50 = vadd.f32 %v2043_v12, %v2042_v37 }
 0x4fd   :  { %3556 = vtanh.f32 %v4083_v50 }
 0x507   :  { %v3557_v49 = vpop.eup %3556 }
 0x508   :  { %v2046_v3 = vmul.f32 %v3557_v49, %v2040_v16 }
 0x50a   :  { %2116 = vmatmul.mubr.f32.vlgmr.msra.gmra.mrb[2].mxu0 %v2046_v3  ;;  %2187 = vmatmul.mubr.f32.vlgmr.msra.gmra.mrb[18].mxu1 %v2046_v3 }
 0x50b   :  { %3229 = vmatpush1.bf16.msra.mxu0 %v3773_v20  ;;  %3261 = vmatpush1.bf16.msra.mxu1 %v3776_v24 }
 0x50c   :  { %3231 = vmatprep.subr.bf16.mxu0 %v3782_v28  ;;  %3263 = vmatprep.subr.bf16.mxu1 %v3785_v32 }
 0x50d   :  { %2283 = vmatprep.mubr.f32.mxu0 %v3676_v0  ;;  %2354 = vmatprep.mubr.f32.mxu1 %v3676_v0 }
 0x50f   :  { %3233 = vmatpush1.bf16.msra.mxu0 %v3787_v33  ;;  %3265 = vmatpush1.bf16.msra.mxu1 %v3791_v36 }
 0x510   :  { %3235 = vmatprep.subr.bf16.mxu0 %v3796_v40  ;;  %3267 = vmatprep.subr.bf16.mxu1 %v3799_v44 }
 0x513   :  { %3237 = vmatpush1.bf16.msra.mxu0 %v3801_v45  ;;  %3269 = vmatpush1.bf16.msra.mxu1 %v3804_v48 }
 0x514   :  { %3239 = vmatprep.subr.bf16.mxu0 %v3808_v52  ;;  %3271 = vmatprep.subr.bf16.mxu1 %v3811_v56 }
 0x517   :  { %3241 = vmatpush1.bf16.msra.mxu0 %v3813_v57  ;;  %3273 = vmatpush1.bf16.msra.mxu1 %v3816_v60 }
 0x518   :  { %3243 = vmatprep.subr.bf16.mxu0 %v3820_v1  ;;  %3275 = vmatprep.subr.bf16.mxu1 %v3823_v5 }
 0x51b   :  { %3245 = vmatpush1.bf16.msra.mxu0 %v3825_v6  ;;  %3277 = vmatpush1.bf16.msra.mxu1 %v3828_v9 }
 0x51c   :  { %3247 = vmatprep.subr.bf16.mxu0 %v3832_v13  ;;  %3279 = vmatprep.subr.bf16.mxu1 %v3835_v18 }
 0x51f   :  { %3249 = vmatpush1.bf16.msra.mxu0 %v3837_v21  ;;  %3281 = vmatpush1.bf16.msra.mxu1 %v3840_v26 }
 0x520   :  { %3251 = vmatprep.subr.bf16.mxu0 %v3843_v31  ;;  %3283 = vmatprep.subr.bf16.mxu1 %v3845_v34 }
 0x523   :  { %3253 = vmatpush1.bf16.msra.mxu0 %v3848_v39  ;;  %3285 = vmatpush1.bf16.msra.mxu1 %v3852_v46 }
 0x524   :  { %3255 = vmatprep.subr.bf16.mxu0 %v3854_v47  ;;  %3287 = vmatprep.subr.bf16.mxu1 %v3857_v53 }
 0x527   :  { %3257 = vmatpush1.bf16.msra.mxu0 %v3860_v59  ;;  %3289 = vmatpush1.bf16.msra.mxu1 %v3864_v61 }
 0x528   :  { %3291 = vmatprep.subr.bf16.mxu0 %v3767_v15  ;;  %3323 = vmatprep.subr.bf16.mxu1 %v3771_v19 }
 0x5dd   :  { %v2117_v43 = vpop.f32.mrb[2].mxu0  ;;  %v2188_v54 = vpop.f32.mrb[18].mxu1 }
 0x5de   :  { %v3464_v55 = vadd.f32 %v2117_v43, %v3877_v7  ;;  %v2119_v14 = vpop.f32.mrb[3].mxu0  ;;  %v2190_v58 = vpop.f32.mrb[19].mxu1  ;;  %v3466_v25 = vadd.f32 %v2188_v54, %v3893_v29 }
 0x5df   :  { %v3465_v17 = vadd.f32 %v2119_v14, %v3881_v8  ;;  %v3467_v11 = vadd.f32 %v2190_v58, %v3889_v22 }
 0x5e0   :  { %v2197_v23 = vmul.f32 0.5, %v3464_v55  ;;  %v2199_v62 = vmul.f32 0.5, %v3466_v25 }
 0x5e1   :  { %v2198_v27 = vmul.f32 0.5, %v3465_v17 }
 0x5e2   :  { %3558 = vtanh.f32 %v2197_v23 }
 0x5e3   :  { %3560 = vtanh.f32 %v2198_v27 }
 0x5e4   :  { %3562 = vtanh.f32 %v3467_v11 }
 0x5e5   :  { %3564 = vtanh.f32 %v2199_v62 }
 0x5ec   :  { %v3559_v10 = vpop.eup %3558 }
 0x5ed   :  { %v2203_v30 = vmul.f32 0.5, %v3559_v10  ;;  %v3561_v38 = vpop.eup %3560 }
 0x5ee   :  { %v2204_v35 = vmul.f32 0.5, %v3561_v38  ;;  %v3563_v12 = vpop.eup %3562 }
 0x5ef   :  { %v2206_v42 = vadd.f32 0.5, %v2203_v30  ;;  %v3565_v49 = vpop.eup %3564 }
 0x5f0   :  { %v2207_v37 = vadd.f32 0.5, %v2204_v35  ;;  %v2205_v3 = vmul.f32 0.5, %v3565_v49 }
 0x5f1   :  { %v2211_v51 = vmul.f32 %v3563_v12, %v2206_v42 }
 0x5f2   :  { %v2210_v41 = vmul.f32 %v2207_v37, %v4083_v50  ;;  %v2208_v43 = vadd.f32 0.5, %v2205_v3 }
 0x5f4   :  { %v4125_v16 = vadd.f32 %v2211_v51, %v2210_v41 }
 0x5f6   :  { %3566 = vtanh.f32 %v4125_v16 }
 0x600   :  { %v3567_v54 = vpop.eup %3566 }
 0x601   :  { %v2214_v55 = vmul.f32 %v3567_v54, %v2208_v43 }
 0x603   :  { %2284 = vmatmul.mubr.f32.vlgmr.msra.gmra.mrb[4].mxu0 %v2214_v55  ;;  %2355 = vmatmul.mubr.f32.vlgmr.msra.gmra.mrb[20].mxu1 %v2214_v55 }
 0x604   :  { %3293 = vmatpush1.bf16.msra.mxu0 %v3773_v20  ;;  %3325 = vmatpush1.bf16.msra.mxu1 %v3776_v24 }
 0x605   :  { %3295 = vmatprep.subr.bf16.mxu0 %v3782_v28  ;;  %3327 = vmatprep.subr.bf16.mxu1 %v3785_v32 }
 0x606   :  { %2451 = vmatprep.mubr.f32.mxu0 %v3676_v0  ;;  %2522 = vmatprep.mubr.f32.mxu1 %v3676_v0 }
 0x608   :  { %3297 = vmatpush1.bf16.msra.mxu0 %v3787_v33  ;;  %3329 = vmatpush1.bf16.msra.mxu1 %v3791_v36 }
 0x609   :  { %3299 = vmatprep.subr.bf16.mxu0 %v3796_v40  ;;  %3331 = vmatprep.subr.bf16.mxu1 %v3799_v44 }
 0x60c   :  { %3301 = vmatpush1.bf16.msra.mxu0 %v3801_v45  ;;  %3333 = vmatpush1.bf16.msra.mxu1 %v3804_v48 }
 0x60d   :  { %3303 = vmatprep.subr.bf16.mxu0 %v3808_v52  ;;  %3335 = vmatprep.subr.bf16.mxu1 %v3811_v56 }
 0x610   :  { %3305 = vmatpush1.bf16.msra.mxu0 %v3813_v57  ;;  %3337 = vmatpush1.bf16.msra.mxu1 %v3816_v60 }
 0x611   :  { %3307 = vmatprep.subr.bf16.mxu0 %v3820_v1  ;;  %3339 = vmatprep.subr.bf16.mxu1 %v3823_v5 }
 0x614   :  { %3309 = vmatpush1.bf16.msra.mxu0 %v3825_v6  ;;  %3341 = vmatpush1.bf16.msra.mxu1 %v3828_v9 }
 0x615   :  { %3311 = vmatprep.subr.bf16.mxu0 %v3832_v13  ;;  %3343 = vmatprep.subr.bf16.mxu1 %v3835_v18 }
 0x618   :  { %3313 = vmatpush1.bf16.msra.mxu0 %v3837_v21  ;;  %3345 = vmatpush1.bf16.msra.mxu1 %v3840_v26 }
 0x619   :  { %3315 = vmatprep.subr.bf16.mxu0 %v3843_v31  ;;  %3347 = vmatprep.subr.bf16.mxu1 %v3845_v34 }
 0x61c   :  { %3317 = vmatpush1.bf16.msra.mxu0 %v3848_v39  ;;  %3349 = vmatpush1.bf16.msra.mxu1 %v3852_v46 }
 0x61d   :  { %3319 = vmatprep.subr.bf16.mxu0 %v3854_v47  ;;  %3351 = vmatprep.subr.bf16.mxu1 %v3857_v53 }
 0x620   :  { %3321 = vmatpush1.bf16.msra.mxu0 %v3860_v59  ;;  %3353 = vmatpush1.bf16.msra.mxu1 %v3864_v61 }
 0x621   :  { %3355 = vmatprep.subr.bf16.mxu0 %v3767_v15  ;;  %3387 = vmatprep.subr.bf16.mxu1 %v3771_v19 }
 0x6d6   :  { %v2285_v50 = vpop.f32.mrb[4].mxu0  ;;  %v2356_v14 = vpop.f32.mrb[20].mxu1 }
 0x6d7   :  { %v3468_v58 = vadd.f32 %v2285_v50, %v3877_v7  ;;  %v2287_v17 = vpop.f32.mrb[5].mxu0  ;;  %v2358_v23 = vpop.f32.mrb[21].mxu1  ;;  %v3470_v10 = vadd.f32 %v2356_v14, %v3893_v29 }
 0x6d8   :  { %v3469_v27 = vadd.f32 %v2287_v17, %v3881_v8  ;;  %v3471_v62 = vadd.f32 %v2358_v23, %v3889_v22  ;;  %v2740_v17 = vld [vmem:[#allocation6 + $0x320] sm:$0xff] }
 0x6d9   :  { %v2365_v11 = vmul.f32 0.5, %v3468_v58  ;;  %v2367_v15 = vmul.f32 0.5, %v3470_v10  ;;  %v2739_v58 = vld [vmem:[#allocation6 + $0x300] sm:$0xff] }
 0x6da   :  { %v2366_v25 = vmul.f32 0.5, %v3469_v27  ;;  %v3428_v23 = vpack.c.bf16 %v2740_v17, %v2739_v58  ;;  %v2741_v27 = vld [vmem:[#allocation6 + $0x340] sm:$0xff] }
 0x6db   :  { %3568 = vtanh.f32 %v2365_v11  ;;  %v2742_v11 = vld [vmem:[#allocation6 + $0x360] sm:$0xff] }
 0x6dc   :  { %3570 = vtanh.f32 %v2366_v25  ;;  %v3431_v25 = vpack.c.bf16 %v2742_v11, %v2741_v27  ;;  %v2744_v10 = vld [vmem:[#allocation6 + $0x3a0] sm:$0xff] }
 0x6dd   :  { %3572 = vtanh.f32 %v3471_v62  ;;  %v2743_v62 = vld [vmem:[#allocation6 + $0x380] sm:$0xff] }
 0x6de   :  { %3574 = vtanh.f32 %v2367_v15  ;;  %v3434_v15 = vpack.c.bf16 %v2744_v10, %v2743_v62 }
 0x6e5   :  { %v3569_v30 = vpop.eup %3568 }
 0x6e6   :  { %v2371_v19 = vmul.f32 0.5, %v3569_v30  ;;  %v3571_v38 = vpop.eup %3570  ;;  %v2745_v30 = vld [vmem:[#allocation6 + $0x3c0] sm:$0xff] }
 0x6e7   :  { %v2372_v35 = vmul.f32 0.5, %v3571_v38  ;;  %v3573_v12 = vpop.eup %3572 }
 0x6e8   :  { %v2374_v42 = vadd.f32 0.5, %v2371_v19  ;;  %v3575_v3 = vpop.eup %3574  ;;  %v2746_v19 = vld [vmem:[#allocation6 + $0x3e0] sm:$0xff] }
 0x6e9   :  { %v2375_v37 = vadd.f32 0.5, %v2372_v35  ;;  %v2373_v43 = vmul.f32 0.5, %v3575_v3  ;;  %v3437_v38 = vpack.c.bf16 %v2746_v19, %v2745_v30  ;;  %v2748_v35 = vld [vmem:[#allocation6 + $0x420] sm:$0xff] }
 0x6ea   :  { %v2379_v51 = vmul.f32 %v3573_v12, %v2374_v42  ;;  %v2747_v42 = vld [vmem:[#allocation6 + $0x400] sm:$0xff] }
 0x6eb   :  { %v2378_v41 = vmul.f32 %v2375_v37, %v4125_v16  ;;  %v2376_v54 = vadd.f32 0.5, %v2373_v43  ;;  %v2738_v16 = vld [vmem:[#allocation6 + $0x2e0] sm:$0xff]  ;;  %v3440_v12 = vpack.c.bf16 %v2748_v35, %v2747_v42 }
 0x6ec   :  { %v2551_v37 = vld [vmem:[#allocation6 + $0x20] ss:$8 sm:$0xf] }
 0x6ed   :  { %v4167_v49 = vadd.f32 %v2379_v51, %v2378_v41  ;;  %v2556_v51 = vrot.slane %v2551_v37, %v50_v2  ;;  %v2560_v41 = vrot.slane %v2551_v37, %v54_v4 }
 0x6ef   :  { %3576 = vtanh.f32 %v4167_v49 }
 0x6f9   :  { %v3577_v55 = vpop.eup %3576 }
 0x6fa   :  { %v2382_v50 = vmul.f32 %v3577_v55, %v2376_v54  ;;  %v4237_v54 = vsub.s32 3, %v3871_v63 }
 0x6fc   :  { %2452 = vmatmul.mubr.f32.vlgmr.msra.gmra.mrb[6].mxu0 %v2382_v50  ;;  %2523 = vmatmul.mubr.f32.vlgmr.msra.gmra.mrb[22].mxu1 %v2382_v50  ;;  %v2568_v55 = vrot.slane %v2551_v37, %v4237_v54 }
 0x6fd   :  { %3357 = vmatpush1.bf16.msra.mxu0 %v3773_v20  ;;  %3389 = vmatpush1.bf16.msra.mxu1 %v3776_v24 }
 0x6fe   :  { %3359 = vmatprep.subr.bf16.mxu0 %v3782_v28  ;;  %3391 = vmatprep.subr.bf16.mxu1 %v3785_v32 }
 0x6ff   :  { %2637 = vmatprep.mubr.f32.mxu0 %v3676_v0  ;;  %2708 = vmatprep.mubr.f32.mxu1 %v3676_v0 }
 0x701   :  { %3361 = vmatpush1.bf16.msra.mxu0 %v3787_v33  ;;  %3393 = vmatpush1.bf16.msra.mxu1 %v3791_v36 }
 0x702   :  { %3363 = vmatprep.subr.bf16.mxu0 %v3796_v40  ;;  %3395 = vmatprep.subr.bf16.mxu1 %v3799_v44 }
 0x705   :  { %3365 = vmatpush1.bf16.msra.mxu0 %v3801_v45  ;;  %3397 = vmatpush1.bf16.msra.mxu1 %v3804_v48 }
 0x706   :  { %3367 = vmatprep.subr.bf16.mxu0 %v3808_v52  ;;  %3399 = vmatprep.subr.bf16.mxu1 %v3811_v56 }
 0x709   :  { %3369 = vmatpush1.bf16.msra.mxu0 %v3813_v57  ;;  %3401 = vmatpush1.bf16.msra.mxu1 %v3816_v60 }
 0x70a   :  { %3371 = vmatprep.subr.bf16.mxu0 %v3820_v1  ;;  %3403 = vmatprep.subr.bf16.mxu1 %v3823_v5 }
 0x70d   :  { %3373 = vmatpush1.bf16.msra.mxu0 %v3825_v6  ;;  %3405 = vmatpush1.bf16.msra.mxu1 %v3828_v9 }
 0x70e   :  { %3375 = vmatprep.subr.bf16.mxu0 %v3832_v13  ;;  %3407 = vmatprep.subr.bf16.mxu1 %v3835_v18 }
 0x711   :  { %3377 = vmatpush1.bf16.msra.mxu0 %v3837_v21  ;;  %3409 = vmatpush1.bf16.msra.mxu1 %v3840_v26 }
 0x712   :  { %3379 = vmatprep.subr.bf16.mxu0 %v3843_v31  ;;  %3411 = vmatprep.subr.bf16.mxu1 %v3845_v34 }
 0x715   :  { %3381 = vmatpush1.bf16.msra.mxu0 %v3848_v39  ;;  %3413 = vmatpush1.bf16.msra.mxu1 %v3852_v46 }
 0x716   :  { %3383 = vmatprep.subr.bf16.mxu0 %v3854_v47  ;;  %3415 = vmatprep.subr.bf16.mxu1 %v3857_v53  ;;  %v2733_v47 = vld [vmem:[#allocation6 + $0x240] sm:$0xff] }
 0x717   :  { %v2734_v53 = vld [vmem:[#allocation6 + $0x260] sm:$0xff] }
 0x719   :  { %3385 = vmatpush1.bf16.msra.mxu0 %v3860_v59  ;;  %3417 = vmatpush1.bf16.msra.mxu1 %v3864_v61  ;;  %v3419_v59 = vpack.c.bf16 %v2734_v53, %v2733_v47  ;;  %v3677_v61 = vmov 0.0|0.0  }
 0x71a   :  { %3418 = vmatprep.subr.bf16.mxu0 %v3677_v61 }
 0x7cf   :  { %v2453_v20 = vpop.f32.mrb[6].mxu0  ;;  %v2524_v24 = vpop.f32.mrb[22].mxu1 }
 0x7d0   :  { %v3472_v28 = vadd.f32 %v2453_v20, %v3877_v7  ;;  %v2455_v32 = vpop.f32.mrb[7].mxu0  ;;  %v2526_v33 = vpop.f32.mrb[23].mxu1  ;;  %v3474_v48 = vadd.f32 %v2524_v24, %v3893_v29  ;;  %v2735_v7 = vld [vmem:[#allocation6 + $0x280] sm:$0xff] }
 0x7d1   :  { %v3473_v36 = vadd.f32 %v2455_v32, %v3881_v8  ;;  %v3475_v45 = vadd.f32 %v2526_v33, %v3889_v22  ;;  %v2736_v8 = vld [vmem:[#allocation6 + $0x2a0] sm:$0xff]  ;;  %v4238_v33 = vsub.s32 2, %v3871_v63 }
 0x7d2   :  { %v2533_v40 = vmul.f32 0.5, %v3472_v28  ;;  %v2535_v52 = vmul.f32 0.5, %v3474_v48  ;;  %v3422_v22 = vpack.c.bf16 %v2736_v8, %v2735_v7  ;;  %v2737_v29 = vld [vmem:[#allocation6 + $0x2c0] sm:$0xff] }
 0x7d3   :  { %v2534_v44 = vmul.f32 0.5, %v3473_v36  ;;  %v3425_v14 = vpack.c.bf16 %v2738_v16, %v2737_v29  ;;  %v2564_v36 = vrot.slane %v2551_v37, %v4238_v33 }
 0x7d4   :  { %3578 = vtanh.f32 %v2533_v40 }
 0x7d5   :  { %3580 = vtanh.f32 %v2534_v44 }
 0x7d6   :  { %3582 = vtanh.f32 %v3475_v45 }
 0x7d7   :  { %3584 = vtanh.f32 %v2535_v52 }
 0x7de   :  { %v3579_v56 = vpop.eup %3578 }
 0x7df   :  { %v2539_v57 = vmul.f32 0.5, %v3579_v56  ;;  %v3581_v60 = vpop.eup %3580 }
 0x7e0   :  { %v2540_v5 = vmul.f32 0.5, %v3581_v60  ;;  %v3583_v6 = vpop.eup %3582 }
 0x7e1   :  { %v2542_v1 = vadd.f32 0.5, %v2539_v57  ;;  %v3585_v26 = vpop.eup %3584 }
 0x7e2   :  { %v2543_v9 = vadd.f32 0.5, %v2540_v5  ;;  %v2541_v31 = vmul.f32 0.5, %v3585_v26  ;;  %v2749_v26 = vld [vmem:[#allocation6 + $0x440] ss:$0 sm:$0xff] }
 0x7e3   :  { %v2547_v13 = vmul.f32 %v3583_v6, %v2542_v1 }
 0x7e4   :  { %v2546_v18 = vmul.f32 %v2543_v9, %v4167_v49  ;;  %v2544_v34 = vadd.f32 0.5, %v2541_v31 }
 0x7e6   :  { %v4207_v21 = vadd.f32 %v2547_v13, %v2546_v18 }
 0x7e8   :  { %3586 = vtanh.f32 %v4207_v21 }
 0x7f2   :  { %v3587_v39 = vpop.eup %3586 }
 0x7f3   :  { %v2550_v46 = vmul.f32 %v3587_v39, %v2544_v34 }
 0x7f5   :  { %2638 = vmatmul.mubr.f32.vlgmr.msra.gmra.mrb[14].mxu0 %v2550_v46  ;;  %2709 = vmatmul.mubr.f32.vlgmr.msra.gmra.mrb[24].mxu1 %v2550_v46 }
 0x7f6   :  { %3420 = vmatpush3.bf16.msra.mxu0 %v3419_v59  ;;  %2903 = vmatprep.mubr.msk.f32.mxu0 %vm3678_vm2, %v3676_v0 }
 0x7f7   :  { %3421 = vmatprep.subr.bf16.mxu0 %v3677_v61 }
 0x7fa   :  { %3423 = vmatpush3.bf16.msra.mxu0 %v3422_v22 }
 0x7fb   :  { %3424 = vmatprep.subr.bf16.mxu0 %v3677_v61 }
 0x7fe   :  { %3426 = vmatpush3.bf16.msra.mxu0 %v3425_v14 }
 0x7ff   :  { %3427 = vmatprep.subr.bf16.mxu0 %v3677_v61 }
 0x802   :  { %3429 = vmatpush3.bf16.msra.mxu0 %v3428_v23 }
 0x803   :  { %3430 = vmatprep.subr.bf16.mxu0 %v3677_v61 }
 0x806   :  { %3432 = vmatpush3.bf16.msra.mxu0 %v3431_v25 }
 0x807   :  { %3433 = vmatprep.subr.bf16.mxu0 %v3677_v61 }
 0x80a   :  { %3435 = vmatpush3.bf16.msra.mxu0 %v3434_v15 }
 0x80b   :  { %3436 = vmatprep.subr.bf16.mxu0 %v3677_v61 }
 0x80e   :  { %3438 = vmatpush3.bf16.msra.mxu0 %v3437_v38 }
 0x80f   :  { %3439 = vmatprep.subr.bf16.mxu0 %v3677_v61 }
 0x812   :  { %3441 = vmatpush3.bf16.msra.mxu0 %v3440_v12 }
 0x8c8   :  { %v2639_v49 = vpop.f32.mrb[14].mxu0  ;;  %v2710_v3 = vpop.f32.mrb[24].mxu1 }
 0x8c9   :  { %v2640_v43 = vadd.f32 %v2639_v49, %v2556_v51  ;;  %v2641_v0 = vpop.f32.mrb[15].mxu0  ;;  %v2712_v50 = vpop.f32.mrb[25].mxu1  ;;  %v2711_v2 = vadd.f32 %v2710_v3, %v2564_v36 }
 0x8ca   :  { %v2642_v20 = vadd.f32 %v2641_v0, %v2560_v41  ;;  %v2713_v32 = vadd.f32 %v2712_v50, %v2568_v55 }
 0x8cb   :  { %v2715_v24 = vmul.f32 0.5, %v2640_v43  ;;  %v2717_v4 = vmul.f32 0.5, %v2711_v2 }
 0x8cc   :  { %v2716_v28 = vmul.f32 0.5, %v2642_v20 }
 0x8cd   :  { %3588 = vtanh.f32 %v2715_v24 }
 0x8ce   :  { %3590 = vtanh.f32 %v2716_v28 }
 0x8cf   :  { %3592 = vtanh.f32 %v2713_v32 }
 0x8d0   :  { %3594 = vtanh.f32 %v2717_v4 }
 0x8d7   :  { %v3589_v40 = vpop.eup %3588 }
 0x8d8   :  { %v2721_v44 = vmul.f32 0.5, %v3589_v40  ;;  %v3591_v45 = vpop.eup %3590 }
 0x8d9   :  { %v2722_v52 = vmul.f32 0.5, %v3591_v45  ;;  %v3593_v56 = vpop.eup %3592 }
 0x8da   :  { %v2724_v48 = vadd.f32 0.5, %v2721_v44  ;;  %v3595_v6 = vpop.eup %3594 }
 0x8db   :  { %v2725_v57 = vadd.f32 0.5, %v2722_v52  ;;  %v2723_v63 = vmul.f32 0.5, %v3595_v6 }
 0x8dc   :  { %v2729_v60 = vmul.f32 %v3593_v56, %v2724_v48 }
 0x8dd   :  { %v2728_v1 = vmul.f32 %v2725_v57, %v4207_v21  ;;  %v2726_v9 = vadd.f32 0.5, %v2723_v63 }
 0x8df   :  { %v2730_v5 = vadd.f32 %v2729_v60, %v2728_v1 }
 0x8e1   :  { %3596 = vtanh.f32 %v2730_v5 }
 0x8eb   :  { %v3597_v13 = vpop.eup %3596 }
 0x8ec   :  { %v2732_v18 = vmul.f32 %v3597_v13, %v2726_v9 }
 0x8ee   :  { %2904 = vmatmul.mubr.f32.vlgmr.msra.gmra.mrb[16].mxu0 %v2732_v18 }
 0x9c1   :  { %v2816_v31 = vpop.f32.mrb[16].mxu0 }
 0x9c2   :  { %v2817_v34 = vadd.f32 %v2816_v31, %v2749_v26  ;;  %v2905_v39 = vpop.f32.mrb[17].mxu0 }
 0x9c4   :  { %2820 = vst [vmem:[#allocation8] sm:$0xff] %v2817_v34 }
 0x9c5   :  { %3653 = shalt.err (!%p3650_p6)
}
 0x9c6   :  { %s3654_s12 = scalar_lea.hbm %s4234_s2, 128 }
 0x9c7   :  { %p3655_p7 = scmp.ne.s32.totalorder %s4234_s2, %s3654_s12  ;;  %p3658_p8 = scmp.lt.u32.totalorder %s3654_s12, %s4234_s2 }
 0x9c9   :  { %p3660_p9 = pnand %p3658_p8, %p3655_p7 }
 0x9cb   :  { %3663 = shalt.err (!%p3660_p9)
}
 0x9cc   :  { %2830 = dma.vmem_to_hbm [thread:$0]  %s2828_s8, 128, %s4234_s2, [#allocation5]  }
 0x9cd   :  { %3668 = dma.done.wait [#allocation5], 128  }
 0x9ce   :  { %3669 = vsyncadd [#allocation5], 4294967168 }
 0x9cf   :  { %2834 = vsyncpa [#allocation4], 1 }
 0x9d0   :  { %2835 = vsyncpa [#allocation7], 1 }
 0x9d1   :  { %2836 = vsyncpa [#allocation5], 1 }

</bundles_post_ra>
